<compile_context>
chip_gen: v7x
topology: tpu7x:2x2x1
jax: 0.10.0
libtpu: 0.0.40
codegen_flags: <defaults>
</compile_context>

<pallas_src>
import math
import functools

import jax
import jax.numpy as jnp
from jax import lax
from jax.experimental import pallas as pl
from jax.experimental.pallas import tpu as pltpu


def _round_up(x, m):
    return ((x + m - 1) // m) * m


def mha_flash_kernel(q_ref, k_ref, v_ref, wqkv_ref, bqkv_ref, wo_ref, bo_ref,
                     o_ref,
                     qp_ref, acc_ref, m_ref, l_ref,
                     *, heads, d_kp, seq_len, scale, compute_dtype):
    f32 = jnp.float32
    cdt = compute_dtype
    kv = pl.program_id(1)
    nkv = pl.num_programs(1)
    bb, s_pad, d_model = q_ref.shape
    tk = k_ref.shape[1]
    d_pp = heads * d_kp
    mq = bb * s_pad
    mk = bb * tk

    # ---- once per batch block: Q projection (pre-scaled by 1/sqrt(d_k)) + init ----
    @pl.when(kv == 0)
    def _init():
        xq = q_ref[...].reshape(mq, d_model).astype(cdt)
        qp = jnp.dot(xq, wqkv_ref[0], preferred_element_type=f32) + bqkv_ref[0]
        qp_ref[...] = (qp * scale).astype(cdt).reshape(bb, s_pad, d_pp)
        m_ref[...] = jnp.full(m_ref.shape, -jnp.inf, dtype=m_ref.dtype)
        l_ref[...] = jnp.zeros(l_ref.shape, dtype=l_ref.dtype)
        acc_ref[...] = jnp.zeros(acc_ref.shape, dtype=acc_ref.dtype)

    # ---- project this KV tile (K, V linear layers), f32 accumulation ----
    xk = k_ref[...].reshape(mk, d_model).astype(cdt)
    xv = v_ref[...].reshape(mk, d_model).astype(cdt)
    kp = (jnp.dot(xk, wqkv_ref[1], preferred_element_type=f32)
          + bqkv_ref[1]).astype(cdt).reshape(bb, tk, d_pp)
    vp = (jnp.dot(xv, wqkv_ref[2], preferred_element_type=f32)
          + bqkv_ref[2]).astype(cdt).reshape(bb, tk, d_pp)

    needs_mask = (s_pad != seq_len)          # static: only when seq was padded
    if needs_mask:
        key_idx = kv * tk + lax.broadcasted_iota(jnp.int32, (1, 1, tk), 2)
        key_mask = key_idx < seq_len

    # ---- per-head online softmax (heads is small & static -> unrolled).
    #      Head slabs are 128-lane aligned, so these slices are layout-free views.
    for h in range(heads):
        lo = h * d_kp
        qh = qp_ref[:, :, lo:lo + d_kp]                      # (bb, s_pad, d_kp)
        kh = kp[:, :, lo:lo + d_kp]
        vh = vp[:, :, lo:lo + d_kp]

        s = lax.dot_general(qh, kh, (((2,), (2,)), ((0,), (0,))),
                            preferred_element_type=f32)      # (bb, s_pad, tk)
        if needs_mask:
            s = jnp.where(key_mask, s, -jnp.inf)

        m_prev = m_ref[h]                                    # (bb, s_pad, 1)
        m_new = jnp.maximum(m_prev, jnp.max(s, axis=-1, keepdims=True))
        alpha = jnp.exp(m_prev - m_new)
        e = jnp.exp(s - m_new)                               # f32 softmax stats
        l_ref[h] = alpha * l_ref[h] + jnp.sum(e, axis=-1, keepdims=True)
        pv = lax.dot_general(e.astype(cdt), vh, (((2,), (1,)), ((0,), (0,))),
                             preferred_element_type=f32)     # (bb, s_pad, d_kp)
        acc_ref[:, :, lo:lo + d_kp] = alpha * acc_ref[:, :, lo:lo + d_kp] + pv
        m_ref[h] = m_new

    # ---- once per batch block: normalize (post-P@V) + ONE output projection ----
    @pl.when(kv == nkv - 1)
    def _finish():
        for h in range(heads):
            lo = h * d_kp
            lh = l_ref[h]
            r = pl.reciprocal(lh, approx=True)               # EUP slot
            r = r * (2.0 - lh * r)                           # one Newton step -> ~f32 exact
            acc_ref[:, :, lo:lo + d_kp] = acc_ref[:, :, lo:lo + d_kp] * r
        ctx = acc_ref[...].astype(cdt).reshape(mq, d_pp)
        out = jnp.dot(ctx, wo_ref[...], preferred_element_type=f32) + bo_ref[...]
        o_ref[...] = out.reshape(bb, s_pad, d_model).astype(o_ref.dtype)


def multi_head_attention(q, k, v, params, *, heads, batch_block=None, kv_block=256,
                         compute_dtype=jnp.bfloat16):
    """q, k, v: (B, S, D) float32.  params: dict of (D, D) weights + (1, D) biases."""
    B, S, D = q.shape
    assert D % heads == 0, "d_model must be divisible by heads"
    d_k = D // heads

    # Per-head slabs padded to whole 128-lane tiles (zero padding keeps math exact).
    lane = 128
    d_kp = _round_up(d_k, lane)
    d_pp = heads * d_kp

    # ---- KV tiling (flash-style) ----
    tk = min(_round_up(kv_block, 8), _round_up(S, 8))
    S_pad = _round_up(S, tk)
    nkv = S_pad // tk

    # ---- batch blocking: aim for several grid steps on the "parallel" axis ----
    bb = batch_block if batch_block is not None else max(1, B // 4)
    bb = max(1, min(bb, B))
    while B % bb:
        bb -= 1
    nb = B // bb

    # ---- pad the sequence axis if not kv-tile aligned (padded keys are masked) ----
    if S_pad != S:
        pad = ((0, 0), (0, S_pad - S), (0, 0))
        q = jnp.pad(q, pad)
        k = jnp.pad(k, pad)
        v = jnp.pad(v, pad)

    # ---- head-aware weight repacking (zero pad d_k -> d_kp per head) ----
    def pack_proj(w, b):
        w = jnp.pad(w.reshape(D, heads, d_k), ((0, 0), (0, 0), (0, d_kp - d_k)))
        b = jnp.pad(b.reshape(1, heads, d_k), ((0, 0), (0, 0), (0, d_kp - d_k)))
        return w.reshape(D, d_pp), b.reshape(1, d_pp)

    wq, bq = pack_proj(params["wq"], params["bq"])
    wk, bk = pack_proj(params["wk"], params["bk"])
    wv, bv = pack_proj(params["wv"], params["bv"])
    wqkv = jnp.stack([wq, wk, wv]).astype(compute_dtype)            # (3, D, d_pp)
    bqkv = jnp.stack([bq, bk, bv]).astype(jnp.float32)              # (3, 1, d_pp)
    wo = jnp.pad(params["wo"].reshape(heads, d_k, D),
                 ((0, 0), (0, d_kp - d_k), (0, 0))).reshape(d_pp, D).astype(compute_dtype)
    bo = params["bo"].astype(jnp.float32)                           # (1, D)

    kernel = functools.partial(
        mha_flash_kernel, heads=heads, d_kp=d_kp, seq_len=S,
        scale=1.0 / math.sqrt(d_k), compute_dtype=compute_dtype)

    # ---- explicit VMEM budget (per perf review); stays within v5e/v6e/v7x limits ----
    f32b = 4
    cdtb = jnp.dtype(compute_dtype).itemsize
    est = (2 * bb * S_pad * D * f32b                   # q block (double-buffered)
           + 2 * 2 * bb * tk * D * f32b                # k, v blocks (double-buffered)
           + 2 * bb * S_pad * D * f32b                 # out block
           + (3 * D * d_pp + d_pp * D) * cdtb          # weights (single VMEM copy)
           + (3 * d_pp + D) * f32b                     # biases
           + bb * S_pad * d_pp * (cdtb + f32b)         # projected-Q + accumulator scratch
           + 2 * heads * bb * S_pad * 128 * f32b       # m / l scratch (lane-padded)
           + 4 * bb * S_pad * max(tk, 128) * f32b)     # score / exp transients
    vmem_limit = int(min(64 * 2 ** 20, max(32 * 2 ** 20, 2 * est)))

    # Weights / biases: whole-array, single-buffered, resident in VMEM.
    vmem_full = pl.BlockSpec(memory_space=pltpu.MemorySpace.VMEM)

    out = pl.pallas_call(
        kernel,
        out_shape=jax.ShapeDtypeStruct((B, S_pad, D), q.dtype),
        grid_spec=pltpu.PrefetchScalarGridSpec(
            num_scalar_prefetch=0,
            grid=(nb, nkv),
            in_specs=[pl.BlockSpec((bb, S_pad, D), lambda b, kvi: (b, 0, 0)),   # q
                      pl.BlockSpec((bb, tk, D), lambda b, kvi: (b, kvi, 0)),    # k
                      pl.BlockSpec((bb, tk, D), lambda b, kvi: (b, kvi, 0)),    # v
                      vmem_full,   # wqkv
                      vmem_full,   # bqkv
                      vmem_full,   # wo
                      vmem_full],  # bo
            out_specs=pl.BlockSpec((bb, S_pad, D), lambda b, kvi: (b, 0, 0)),
            scratch_shapes=[pltpu.VMEM((bb, S_pad, d_pp), compute_dtype),   # projected Q
                            pltpu.VMEM((bb, S_pad, d_pp), jnp.float32),     # online acc
                            pltpu.VMEM((heads, bb, S_pad, 1), jnp.float32), # running max
                            pltpu.VMEM((heads, bb, S_pad, 1), jnp.float32)] # running denom
        ),
        compiler_params=pltpu.CompilerParams(
            dimension_semantics=("parallel", "arbitrary"),
            vmem_limit_bytes=vmem_limit),
    )(q, k, v, wqkv, bqkv, wo, bo)

    # Output is already un-padded along d_model; only drop seq padding if any.
    return out if S_pad == S else out[:, :S, :]


def reference_mha(q, k, v, params, *, heads):
    """Pure-JAX reference mirroring the PyTorch forward."""
    B, S, D = q.shape
    d_k = D // heads

    def lin(x, w, b):
        return x @ w + b

    Q = lin(q, params["wq"], params["bq"]).reshape(B, S, heads, d_k).transpose(0, 2, 1, 3)
    K = lin(k, params["wk"], params["bk"]).reshape(B, S, heads, d_k).transpose(0, 2, 1, 3)
    V = lin(v, params["wv"], params["bv"]).reshape(B, S, heads, d_k).transpose(0, 2, 1, 3)

    scores = jnp.einsum("bhqd,bhkd->bhqk", Q, K) / math.sqrt(d_k)
    scores = jax.nn.softmax(scores, axis=-1)
    out = jnp.einsum("bhqk,bhkd->bhqd", scores, V)
    concat = out.transpose(0, 2, 1, 3).reshape(B, S, D)
    return concat @ params["wo"] + params["bo"]


def _make_params(key, D):
    init = 1.0 / math.sqrt(D)
    ks = jax.random.split(key, 8)
    names = ["wq", "bq", "wk", "bk", "wv", "bv", "wo", "bo"]
    shapes = [(D, D), (1, D), (D, D), (1, D), (D, D), (1, D), (D, D), (1, D)]
    return {n: jax.random.uniform(kk, s, jnp.float32, -init, init)
            for n, kk, s in zip(names, ks, shapes)}


if __name__ == "__main__":
    key = jax.random.PRNGKey(0)
    k0, k1, k2, k3, k4 = jax.random.split(key, 5)

    # ---- test 1: nominal small shape (single KV tile, no seq padding) ----
    B, S, D, H = 2, 8, 32, 4
    params = _make_params(k0, D)
    q = jax.random.normal(k1, (B, S, D), jnp.float32)
    k_in = jax.random.normal(k2, (B, S, D), jnp.float32)
    v = jax.random.normal(k3, (B, S, D), jnp.float32)
    ref = reference_mha(q, k_in, v, params, heads=H)

    # f32 MXU operands: strict parity with the float32 PyTorch module.
    out_f32 = jax.block_until_ready(
        multi_head_attention(q, k_in, v, params, heads=H, compute_dtype=jnp.float32))
    assert out_f32.shape == (B, S, D)
    assert jnp.allclose(out_f32, ref, atol=1e-3, rtol=1e-3), "f32 path mismatch"

    # bf16 MXU operands (default perf path; f32 accumulation + f32 softmax stats).
    out_bf16 = jax.block_until_ready(
        multi_head_attention(q, k_in, v, params, heads=H))
    assert out_bf16.shape == (B, S, D)
    assert jnp.allclose(out_bf16, ref, atol=3e-2, rtol=3e-2), "bf16 path mismatch"

    # ---- test 2: multi-tile flash path + key-padding mask (S=20, kv_block=8, B=4) ----
    B2, S2 = 4, 20
    q2 = jax.random.normal(k4, (B2, S2, D), jnp.float32)
    ref2 = reference_mha(q2, q2, q2, params, heads=H)
    out2 = jax.block_until_ready(
        multi_head_attention(q2, q2, q2, params, heads=H, kv_block=8,
                             compute_dtype=jnp.float32))
    assert out2.shape == (B2, S2, D)
    assert jnp.allclose(out2, ref2, atol=1e-3, rtol=1e-3), "flash/mask path mismatch"

    print("KERNEL_OK")
</pallas_src>

<mosaic_0001>
module attributes {stable_mosaic.version = 11 : i64} {
  func.func @mha_flash_kernel(%arg0: i32, %arg1: i32, %arg2: memref<1x8x32xf32, #tpu.memory_space<vmem>>, %arg3: memref<1x8x32xf32, #tpu.memory_space<vmem>>, %arg4: memref<1x8x32xf32, #tpu.memory_space<vmem>>, %arg5: memref<3x32x512xf32, #tpu.memory_space<vmem>>, %arg6: memref<3x1x512xf32, #tpu.memory_space<vmem>>, %arg7: memref<512x32xf32, #tpu.memory_space<vmem>>, %arg8: memref<1x32xf32, #tpu.memory_space<vmem>>, %arg9: memref<1x8x32xf32, #tpu.memory_space<vmem>>, %arg10: memref<1x8x512xf32, #tpu.memory_space<vmem>>, %arg11: memref<1x8x512xf32, #tpu.memory_space<vmem>>, %arg12: memref<4x1x8x1xf32, #tpu.memory_space<vmem>>, %arg13: memref<4x1x8x1xf32, #tpu.memory_space<vmem>>) attributes {dimension_semantics = [#tpu.dimension_semantics<parallel>, #tpu.dimension_semantics<arbitrary>], iteration_bounds = array<i64: 2, 1>, scalar_prefetch = 0 : i64, scratch_operands = 4 : i64, tpu.core_type = #tpu.core_type<tc>, window_params = [{transform_indices = @transform_0, window_bounds = array<i64: 1, 8, 32>}, {transform_indices = @transform_1, window_bounds = array<i64: 1, 8, 32>}, {transform_indices = @transform_2, window_bounds = array<i64: 1, 8, 32>}, {pipeline_mode = #tpu.pipeline_mode<synchronous>, transform_indices = @transform_3, window_bounds = array<i64: 3, 32, 512>}, {pipeline_mode = #tpu.pipeline_mode<synchronous>, transform_indices = @transform_4, window_bounds = array<i64: 3, 1, 512>}, {pipeline_mode = #tpu.pipeline_mode<synchronous>, transform_indices = @transform_5, window_bounds = array<i64: 512, 32>}, {pipeline_mode = #tpu.pipeline_mode<synchronous>, transform_indices = @transform_6, window_bounds = array<i64: 1, 32>}, {transform_indices = @transform_7, window_bounds = array<i64: 1, 8, 32>}]} {
    %c0_i32 = arith.constant 0 : i32
    %0 = arith.cmpi eq, %arg1, %c0_i32 : i32
    %1 = arith.extui %0 : i1 to i32
    %c0_i32_0 = arith.constant 0 : i32
    %2 = arith.cmpi ne, %1, %c0_i32_0 : i32
    scf.if %2 {
      %c0_131 = arith.constant 0 : index
      %c0_132 = arith.constant 0 : index
      %c0_133 = arith.constant 0 : index
      %154 = vector.load %arg2[%c0_131, %c0_132, %c0_133] : memref<1x8x32xf32, #tpu.memory_space<vmem>>, vector<1x8x32xf32>
      %155 = vector.shape_cast %154 : vector<1x8x32xf32> to vector<8x32xf32>
      %c0_134 = arith.constant 0 : index
      %c0_135 = arith.constant 0 : index
      %c0_136 = arith.constant 0 : index
      %156 = vector.load %arg5[%c0_134, %c0_135, %c0_136] : memref<3x32x512xf32, #tpu.memory_space<vmem>>, vector<1x32x512xf32>
      %157 = vector.shape_cast %156 : vector<1x32x512xf32> to vector<32x512xf32>
      %cst_137 = arith.constant dense<0.000000e+00> : vector<8x512xf32>
      %158 = tpu.matmul %155, %157, %cst_137 {dimension_numbers = #tpu.dot_dimension_numbers<[1], [0], [0], [1], [0, 0, 1, 1], [], []>} : vector<8x32xf32>, vector<32x512xf32>, vector<8x512xf32> -> vector<8x512xf32>
      %c0_138 = arith.constant 0 : index
      %c0_139 = arith.constant 0 : index
      %c0_140 = arith.constant 0 : index
      %159 = vector.load %arg6[%c0_138, %c0_139, %c0_140] : memref<3x1x512xf32, #tpu.memory_space<vmem>>, vector<1x1x512xf32>
      %160 = vector.shape_cast %159 : vector<1x1x512xf32> to vector<1x512xf32>
      %161 = vector.broadcast %160 : vector<1x512xf32> to vector<8x512xf32>
      %162 = arith.addf %158, %161 : vector<8x512xf32>
      %cst_141 = arith.constant 0.353553385 : f32
      %163 = vector.broadcast %cst_141 : f32 to vector<8x512xf32>
      %164 = arith.mulf %162, %163 : vector<8x512xf32>
      %165 = vector.shape_cast %164 : vector<8x512xf32> to vector<1x8x512xf32>
      %c0_142 = arith.constant 0 : index
      %c0_143 = arith.constant 0 : index
      %c0_144 = arith.constant 0 : index
      %166 = vector.load %arg10[%c0_142, %c0_143, %c0_144] : memref<1x8x512xf32, #tpu.memory_space<vmem>>, vector<1x8x512xf32>
      tpu.vector_store %arg10[%c0_142, %c0_143, %c0_144], %165 {strides = array<i32>} : memref<1x8x512xf32, #tpu.memory_space<vmem>>, vector<1x8x512xf32>,
      %cst_145 = arith.constant 0xFF800000 : f32
      %167 = vector.broadcast %cst_145 : f32 to vector<4x1x8x1xf32>
      %c0_146 = arith.constant 0 : index
      %c0_147 = arith.constant 0 : index
      %c0_148 = arith.constant 0 : index
      %c0_149 = arith.constant 0 : index
      %168 = vector.load %arg12[%c0_146, %c0_147, %c0_148, %c0_149] : memref<4x1x8x1xf32, #tpu.memory_space<vmem>>, vector<4x1x8x1xf32>
      tpu.vector_store %arg12[%c0_146, %c0_147, %c0_148, %c0_149], %167 {strides = array<i32>} : memref<4x1x8x1xf32, #tpu.memory_space<vmem>>, vector<4x1x8x1xf32>,
      %cst_150 = arith.constant 0.000000e+00 : f32
      %169 = vector.broadcast %cst_150 : f32 to vector<4x1x8x1xf32>
      %c0_151 = arith.constant 0 : index
      %c0_152 = arith.constant 0 : index
      %c0_153 = arith.constant 0 : index
      %c0_154 = arith.constant 0 : index
      %170 = vector.load %arg13[%c0_151, %c0_152, %c0_153, %c0_154] : memref<4x1x8x1xf32, #tpu.memory_space<vmem>>, vector<4x1x8x1xf32>
      tpu.vector_store %arg13[%c0_151, %c0_152, %c0_153, %c0_154], %169 {strides = array<i32>} : memref<4x1x8x1xf32, #tpu.memory_space<vmem>>, vector<4x1x8x1xf32>,
      %cst_155 = arith.constant 0.000000e+00 : f32
      %171 = vector.broadcast %cst_155 : f32 to vector<1x8x512xf32>
      %c0_156 = arith.constant 0 : index
      %c0_157 = arith.constant 0 : index
      %c0_158 = arith.constant 0 : index
      %172 = vector.load %arg11[%c0_156, %c0_157, %c0_158] : memref<1x8x512xf32, #tpu.memory_space<vmem>>, vector<1x8x512xf32>
      tpu.vector_store %arg11[%c0_156, %c0_157, %c0_158], %171 {strides = array<i32>} : memref<1x8x512xf32, #tpu.memory_space<vmem>>, vector<1x8x512xf32>,
    } else {
    }
    %c0 = arith.constant 0 : index
    %c0_1 = arith.constant 0 : index
    %c0_2 = arith.constant 0 : index
    %3 = vector.load %arg3[%c0, %c0_1, %c0_2] : memref<1x8x32xf32, #tpu.memory_space<vmem>>, vector<1x8x32xf32>
    %4 = vector.shape_cast %3 : vector<1x8x32xf32> to vector<8x32xf32>
    %c0_3 = arith.constant 0 : index
    %c0_4 = arith.constant 0 : index
    %c0_5 = arith.constant 0 : index
    %5 = vector.load %arg4[%c0_3, %c0_4, %c0_5] : memref<1x8x32xf32, #tpu.memory_space<vmem>>, vector<1x8x32xf32>
    %6 = vector.shape_cast %5 : vector<1x8x32xf32> to vector<8x32xf32>
    %c1 = arith.constant 1 : index
    %c0_6 = arith.constant 0 : index
    %c0_7 = arith.constant 0 : index
    %7 = vector.load %arg5[%c1, %c0_6, %c0_7] : memref<3x32x512xf32, #tpu.memory_space<vmem>>, vector<1x32x512xf32>
    %8 = vector.shape_cast %7 : vector<1x32x512xf32> to vector<32x512xf32>
    %cst = arith.constant dense<0.000000e+00> : vector<8x512xf32>
    %9 = tpu.matmul %4, %8, %cst {dimension_numbers = #tpu.dot_dimension_numbers<[1], [0], [0], [1], [0, 0, 1, 1], [], []>} : vector<8x32xf32>, vector<32x512xf32>, vector<8x512xf32> -> vector<8x512xf32>
    %c1_8 = arith.constant 1 : index
    %c0_9 = arith.constant 0 : index
    %c0_10 = arith.constant 0 : index
    %10 = vector.load %arg6[%c1_8, %c0_9, %c0_10] : memref<3x1x512xf32, #tpu.memory_space<vmem>>, vector<1x1x512xf32>
    %11 = vector.shape_cast %10 : vector<1x1x512xf32> to vector<1x512xf32>
    %12 = vector.broadcast %11 : vector<1x512xf32> to vector<8x512xf32>
    %13 = arith.addf %9, %12 : vector<8x512xf32>
    %14 = vector.shape_cast %13 : vector<8x512xf32> to vector<1x8x512xf32>
    %c2 = arith.constant 2 : index
    %c0_11 = arith.constant 0 : index
    %c0_12 = arith.constant 0 : index
    %15 = vector.load %arg5[%c2, %c0_11, %c0_12] : memref<3x32x512xf32, #tpu.memory_space<vmem>>, vector<1x32x512xf32>
    %16 = vector.shape_cast %15 : vector<1x32x512xf32> to vector<32x512xf32>
    %cst_13 = arith.constant dense<0.000000e+00> : vector<8x512xf32>
    %17 = tpu.matmul %6, %16, %cst_13 {dimension_numbers = #tpu.dot_dimension_numbers<[1], [0], [0], [1], [0, 0, 1, 1], [], []>} : vector<8x32xf32>, vector<32x512xf32>, vector<8x512xf32> -> vector<8x512xf32>
    %c2_14 = arith.constant 2 : index
    %c0_15 = arith.constant 0 : index
    %c0_16 = arith.constant 0 : index
    %18 = vector.load %arg6[%c2_14, %c0_15, %c0_16] : memref<3x1x512xf32, #tpu.memory_space<vmem>>, vector<1x1x512xf32>
    %19 = vector.shape_cast %18 : vector<1x1x512xf32> to vector<1x512xf32>
    %20 = vector.broadcast %19 : vector<1x512xf32> to vector<8x512xf32>
    %21 = arith.addf %17, %20 : vector<8x512xf32>
    %22 = vector.shape_cast %21 : vector<8x512xf32> to vector<1x8x512xf32>
    %c0_17 = arith.constant 0 : index
    %c0_18 = arith.constant 0 : index
    %c0_19 = arith.constant 0 : index
    %23 = vector.load %arg10[%c0_17, %c0_18, %c0_19] : memref<1x8x512xf32, #tpu.memory_space<vmem>>, vector<1x8x128xf32>
    %24 = vector.extract_strided_slice %14 {offsets = [0, 0, 0], sizes = [1, 8, 128], strides = [1, 1, 1]} : vector<1x8x512xf32> to vector<1x8x128xf32>
    %25 = vector.extract_strided_slice %22 {offsets = [0, 0, 0], sizes = [1, 8, 128], strides = [1, 1, 1]} : vector<1x8x512xf32> to vector<1x8x128xf32>
    %cst_20 = arith.constant dense<0.000000e+00> : vector<1x8x8xf32>
    %26 = tpu.matmul %23, %24, %cst_20 {dimension_numbers = #tpu.dot_dimension_numbers<[2], [2], [1], [1], [0, 0, 0, 1, 1, 1], [0], [0]>} : vector<1x8x128xf32>, vector<1x8x128xf32>, vector<1x8x8xf32> -> vector<1x8x8xf32>
    %c0_21 = arith.constant 0 : index
    %c0_22 = arith.constant 0 : index
    %c0_23 = arith.constant 0 : index
    %c0_24 = arith.constant 0 : index
    %27 = vector.load %arg12[%c0_21, %c0_22, %c0_23, %c0_24] : memref<4x1x8x1xf32, #tpu.memory_space<vmem>>, vector<1x1x8x1xf32>
    %28 = vector.shape_cast %27 : vector<1x1x8x1xf32> to vector<1x8x1xf32>
    %cst_25 = arith.constant dense<0xFF800000> : vector<1x8xf32>
    %29 = vector.multi_reduction <maximumf>, %26, %cst_25 [2] : vector<1x8x8xf32> to vector<1x8xf32>
    %30 = vector.shape_cast %29 : vector<1x8xf32> to vector<1x8x1xf32>
    %31 = arith.maximumf %28, %30 : vector<1x8x1xf32>
    %32 = arith.subf %28, %31 : vector<1x8x1xf32>
    %33 = math.exp %32 : vector<1x8x1xf32>
    %34 = vector.broadcast %31 : vector<1x8x1xf32> to vector<1x8x8xf32>
    %35 = arith.subf %26, %34 : vector<1x8x8xf32>
    %36 = math.exp %35 : vector<1x8x8xf32>
    %c0_26 = arith.constant 0 : index
    %c0_27 = arith.constant 0 : index
    %c0_28 = arith.constant 0 : index
    %c0_29 = arith.constant 0 : index
    %37 = vector.load %arg13[%c0_26, %c0_27, %c0_28, %c0_29] : memref<4x1x8x1xf32, #tpu.memory_space<vmem>>, vector<1x1x8x1xf32>
    %38 = vector.shape_cast %37 : vector<1x1x8x1xf32> to vector<1x8x1xf32>
    %39 = arith.mulf %33, %38 : vector<1x8x1xf32>
    %cst_30 = arith.constant dense<0.000000e+00> : vector<1x8xf32>
    %40 = vector.multi_reduction <add>, %36, %cst_30 [2] : vector<1x8x8xf32> to vector<1x8xf32>
    %41 = vector.shape_cast %40 : vector<1x8xf32> to vector<1x8x1xf32>
    %42 = arith.addf %39, %41 : vector<1x8x1xf32>
    %c0_31 = arith.constant 0 : index
    %c0_32 = arith.constant 0 : index
    %c0_33 = arith.constant 0 : index
    %c0_34 = arith.constant 0 : index
    %43 = vector.load %arg13[%c0_31, %c0_32, %c0_33, %c0_34] : memref<4x1x8x1xf32, #tpu.memory_space<vmem>>, vector<1x1x8x1xf32>
    %44 = vector.shape_cast %43 : vector<1x1x8x1xf32> to vector<1x8x1xf32>
    %45 = vector.shape_cast %42 : vector<1x8x1xf32> to vector<1x1x8x1xf32>
    tpu.vector_store %arg13[%c0_31, %c0_32, %c0_33, %c0_34], %45 {strides = array<i32>} : memref<4x1x8x1xf32, #tpu.memory_space<vmem>>, vector<1x1x8x1xf32>,
    %cst_35 = arith.constant dense<0.000000e+00> : vector<1x8x128xf32>
    %46 = tpu.matmul %36, %25, %cst_35 {dimension_numbers = #tpu.dot_dimension_numbers<[2], [1], [1], [2], [0, 0, 0, 1, 1, 2], [0], [0]>} : vector<1x8x8xf32>, vector<1x8x128xf32>, vector<1x8x128xf32> -> vector<1x8x128xf32>
    %c0_36 = arith.constant 0 : index
    %c0_37 = arith.constant 0 : index
    %c0_38 = arith.constant 0 : index
    %47 = vector.load %arg11[%c0_36, %c0_37, %c0_38] : memref<1x8x512xf32, #tpu.memory_space<vmem>>, vector<1x8x128xf32>
    %48 = vector.broadcast %33 : vector<1x8x1xf32> to vector<1x8x128xf32>
    %49 = arith.mulf %48, %47 : vector<1x8x128xf32>
    %50 = arith.addf %49, %46 : vector<1x8x128xf32>
    %c0_39 = arith.constant 0 : index
    %c0_40 = arith.constant 0 : index
    %c0_41 = arith.constant 0 : index
    %51 = vector.load %arg11[%c0_39, %c0_40, %c0_41] : memref<1x8x512xf32, #tpu.memory_space<vmem>>, vector<1x8x128xf32>
    tpu.vector_store %arg11[%c0_39, %c0_40, %c0_41], %50 {strides = array<i32>} : memref<1x8x512xf32, #tpu.memory_space<vmem>>, vector<1x8x128xf32>,
    %c0_42 = arith.constant 0 : index
    %c0_43 = arith.constant 0 : index
    %c0_44 = arith.constant 0 : index
    %c0_45 = arith.constant 0 : index
    %52 = vector.load %arg12[%c0_42, %c0_43, %c0_44, %c0_45] : memref<4x1x8x1xf32, #tpu.memory_space<vmem>>, vector<1x1x8x1xf32>
    %53 = vector.shape_cast %52 : vector<1x1x8x1xf32> to vector<1x8x1xf32>
    %54 = vector.shape_cast %31 : vector<1x8x1xf32> to vector<1x1x8x1xf32>
    tpu.vector_store %arg12[%c0_42, %c0_43, %c0_44, %c0_45], %54 {strides = array<i32>} : memref<4x1x8x1xf32, #tpu.memory_space<vmem>>, vector<1x1x8x1xf32>,
    %c0_46 = arith.constant 0 : index
    %c0_47 = arith.constant 0 : index
    %c128 = arith.constant 128 : index
    %55 = vector.load %arg10[%c0_46, %c0_47, %c128] : memref<1x8x512xf32, #tpu.memory_space<vmem>>, vector<1x8x128xf32>
    %56 = vector.extract_strided_slice %14 {offsets = [0, 0, 128], sizes = [1, 8, 128], strides = [1, 1, 1]} : vector<1x8x512xf32> to vector<1x8x128xf32>
    %57 = vector.extract_strided_slice %22 {offsets = [0, 0, 128], sizes = [1, 8, 128], strides = [1, 1, 1]} : vector<1x8x512xf32> to vector<1x8x128xf32>
    %cst_48 = arith.constant dense<0.000000e+00> : vector<1x8x8xf32>
    %58 = tpu.matmul %55, %56, %cst_48 {dimension_numbers = #tpu.dot_dimension_numbers<[2], [2], [1], [1], [0, 0, 0, 1, 1, 1], [0], [0]>} : vector<1x8x128xf32>, vector<1x8x128xf32>, vector<1x8x8xf32> -> vector<1x8x8xf32>
    %c1_49 = arith.constant 1 : index
    %c0_50 = arith.constant 0 : index
    %c0_51 = arith.constant 0 : index
    %c0_52 = arith.constant 0 : index
    %59 = vector.load %arg12[%c1_49, %c0_50, %c0_51, %c0_52] : memref<4x1x8x1xf32, #tpu.memory_space<vmem>>, vector<1x1x8x1xf32>
    %60 = vector.shape_cast %59 : vector<1x1x8x1xf32> to vector<1x8x1xf32>
    %cst_53 = arith.constant dense<0xFF800000> : vector<1x8xf32>
    %61 = vector.multi_reduction <maximumf>, %58, %cst_53 [2] : vector<1x8x8xf32> to vector<1x8xf32>
    %62 = vector.shape_cast %61 : vector<1x8xf32> to vector<1x8x1xf32>
    %63 = arith.maximumf %60, %62 : vector<1x8x1xf32>
    %64 = arith.subf %60, %63 : vector<1x8x1xf32>
    %65 = math.exp %64 : vector<1x8x1xf32>
    %66 = vector.broadcast %63 : vector<1x8x1xf32> to vector<1x8x8xf32>
    %67 = arith.subf %58, %66 : vector<1x8x8xf32>
    %68 = math.exp %67 : vector<1x8x8xf32>
    %c1_54 = arith.constant 1 : index
    %c0_55 = arith.constant 0 : index
    %c0_56 = arith.constant 0 : index
    %c0_57 = arith.constant 0 : index
    %69 = vector.load %arg13[%c1_54, %c0_55, %c0_56, %c0_57] : memref<4x1x8x1xf32, #tpu.memory_space<vmem>>, vector<1x1x8x1xf32>
    %70 = vector.shape_cast %69 : vector<1x1x8x1xf32> to vector<1x8x1xf32>
    %71 = arith.mulf %65, %70 : vector<1x8x1xf32>
    %cst_58 = arith.constant dense<0.000000e+00> : vector<1x8xf32>
    %72 = vector.multi_reduction <add>, %68, %cst_58 [2] : vector<1x8x8xf32> to vector<1x8xf32>
    %73 = vector.shape_cast %72 : vector<1x8xf32> to vector<1x8x1xf32>
    %74 = arith.addf %71, %73 : vector<1x8x1xf32>
    %c1_59 = arith.constant 1 : index
    %c0_60 = arith.constant 0 : index
    %c0_61 = arith.constant 0 : index
    %c0_62 = arith.constant 0 : index
    %75 = vector.load %arg13[%c1_59, %c0_60, %c0_61, %c0_62] : memref<4x1x8x1xf32, #tpu.memory_space<vmem>>, vector<1x1x8x1xf32>
    %76 = vector.shape_cast %75 : vector<1x1x8x1xf32> to vector<1x8x1xf32>
    %77 = vector.shape_cast %74 : vector<1x8x1xf32> to vector<1x1x8x1xf32>
    tpu.vector_store %arg13[%c1_59, %c0_60, %c0_61, %c0_62], %77 {strides = array<i32>} : memref<4x1x8x1xf32, #tpu.memory_space<vmem>>, vector<1x1x8x1xf32>,
    %cst_63 = arith.constant dense<0.000000e+00> : vector<1x8x128xf32>
    %78 = tpu.matmul %68, %57, %cst_63 {dimension_numbers = #tpu.dot_dimension_numbers<[2], [1], [1], [2], [0, 0, 0, 1, 1, 2], [0], [0]>} : vector<1x8x8xf32>, vector<1x8x128xf32>, vector<1x8x128xf32> -> vector<1x8x128xf32>
    %c0_64 = arith.constant 0 : index
    %c0_65 = arith.constant 0 : index
    %c128_66 = arith.constant 128 : index
    %79 = vector.load %arg11[%c0_64, %c0_65, %c128_66] : memref<1x8x512xf32, #tpu.memory_space<vmem>>, vector<1x8x128xf32>
    %80 = vector.broadcast %65 : vector<1x8x1xf32> to vector<1x8x128xf32>
    %81 = arith.mulf %80, %79 : vector<1x8x128xf32>
    %82 = arith.addf %81, %78 : vector<1x8x128xf32>
    %c0_67 = arith.constant 0 : index
    %c0_68 = arith.constant 0 : index
    %c128_69 = arith.constant 128 : index
    %83 = vector.load %arg11[%c0_67, %c0_68, %c128_69] : memref<1x8x512xf32, #tpu.memory_space<vmem>>, vector<1x8x128xf32>
    tpu.vector_store %arg11[%c0_67, %c0_68, %c128_69], %82 {strides = array<i32>} : memref<1x8x512xf32, #tpu.memory_space<vmem>>, vector<1x8x128xf32>,
    %c1_70 = arith.constant 1 : index
    %c0_71 = arith.constant 0 : index
    %c0_72 = arith.constant 0 : index
    %c0_73 = arith.constant 0 : index
    %84 = vector.load %arg12[%c1_70, %c0_71, %c0_72, %c0_73] : memref<4x1x8x1xf32, #tpu.memory_space<vmem>>, vector<1x1x8x1xf32>
    %85 = vector.shape_cast %84 : vector<1x1x8x1xf32> to vector<1x8x1xf32>
    %86 = vector.shape_cast %63 : vector<1x8x1xf32> to vector<1x1x8x1xf32>
    tpu.vector_store %arg12[%c1_70, %c0_71, %c0_72, %c0_73], %86 {strides = array<i32>} : memref<4x1x8x1xf32, #tpu.memory_space<vmem>>, vector<1x1x8x1xf32>,
    %c0_74 = arith.constant 0 : index
    %c0_75 = arith.constant 0 : index
    %c256 = arith.constant 256 : index
    %87 = vector.load %arg10[%c0_74, %c0_75, %c256] : memref<1x8x512xf32, #tpu.memory_space<vmem>>, vector<1x8x128xf32>
    %88 = vector.extract_strided_slice %14 {offsets = [0, 0, 256], sizes = [1, 8, 128], strides = [1, 1, 1]} : vector<1x8x512xf32> to vector<1x8x128xf32>
    %89 = vector.extract_strided_slice %22 {offsets = [0, 0, 256], sizes = [1, 8, 128], strides = [1, 1, 1]} : vector<1x8x512xf32> to vector<1x8x128xf32>
    %cst_76 = arith.constant dense<0.000000e+00> : vector<1x8x8xf32>
    %90 = tpu.matmul %87, %88, %cst_76 {dimension_numbers = #tpu.dot_dimension_numbers<[2], [2], [1], [1], [0, 0, 0, 1, 1, 1], [0], [0]>} : vector<1x8x128xf32>, vector<1x8x128xf32>, vector<1x8x8xf32> -> vector<1x8x8xf32>
    %c2_77 = arith.constant 2 : index
    %c0_78 = arith.constant 0 : index
    %c0_79 = arith.constant 0 : index
    %c0_80 = arith.constant 0 : index
    %91 = vector.load %arg12[%c2_77, %c0_78, %c0_79, %c0_80] : memref<4x1x8x1xf32, #tpu.memory_space<vmem>>, vector<1x1x8x1xf32>
    %92 = vector.shape_cast %91 : vector<1x1x8x1xf32> to vector<1x8x1xf32>
    %cst_81 = arith.constant dense<0xFF800000> : vector<1x8xf32>
    %93 = vector.multi_reduction <maximumf>, %90, %cst_81 [2] : vector<1x8x8xf32> to vector<1x8xf32>
    %94 = vector.shape_cast %93 : vector<1x8xf32> to vector<1x8x1xf32>
    %95 = arith.maximumf %92, %94 : vector<1x8x1xf32>
    %96 = arith.subf %92, %95 : vector<1x8x1xf32>
    %97 = math.exp %96 : vector<1x8x1xf32>
    %98 = vector.broadcast %95 : vector<1x8x1xf32> to vector<1x8x8xf32>
    %99 = arith.subf %90, %98 : vector<1x8x8xf32>
    %100 = math.exp %99 : vector<1x8x8xf32>
    %c2_82 = arith.constant 2 : index
    %c0_83 = arith.constant 0 : index
    %c0_84 = arith.constant 0 : index
    %c0_85 = arith.constant 0 : index
    %101 = vector.load %arg13[%c2_82, %c0_83, %c0_84, %c0_85] : memref<4x1x8x1xf32, #tpu.memory_space<vmem>>, vector<1x1x8x1xf32>
    %102 = vector.shape_cast %101 : vector<1x1x8x1xf32> to vector<1x8x1xf32>
    %103 = arith.mulf %97, %102 : vector<1x8x1xf32>
    %cst_86 = arith.constant dense<0.000000e+00> : vector<1x8xf32>
    %104 = vector.multi_reduction <add>, %100, %cst_86 [2] : vector<1x8x8xf32> to vector<1x8xf32>
    %105 = vector.shape_cast %104 : vector<1x8xf32> to vector<1x8x1xf32>
    %106 = arith.addf %103, %105 : vector<1x8x1xf32>
    %c2_87 = arith.constant 2 : index
    %c0_88 = arith.constant 0 : index
    %c0_89 = arith.constant 0 : index
    %c0_90 = arith.constant 0 : index
    %107 = vector.load %arg13[%c2_87, %c0_88, %c0_89, %c0_90] : memref<4x1x8x1xf32, #tpu.memory_space<vmem>>, vector<1x1x8x1xf32>
    %108 = vector.shape_cast %107 : vector<1x1x8x1xf32> to vector<1x8x1xf32>
    %109 = vector.shape_cast %106 : vector<1x8x1xf32> to vector<1x1x8x1xf32>
    tpu.vector_store %arg13[%c2_87, %c0_88, %c0_89, %c0_90], %109 {strides = array<i32>} : memref<4x1x8x1xf32, #tpu.memory_space<vmem>>, vector<1x1x8x1xf32>,
    %cst_91 = arith.constant dense<0.000000e+00> : vector<1x8x128xf32>
    %110 = tpu.matmul %100, %89, %cst_91 {dimension_numbers = #tpu.dot_dimension_numbers<[2], [1], [1], [2], [0, 0, 0, 1, 1, 2], [0], [0]>} : vector<1x8x8xf32>, vector<1x8x128xf32>, vector<1x8x128xf32> -> vector<1x8x128xf32>
    %c0_92 = arith.constant 0 : index
    %c0_93 = arith.constant 0 : index
    %c256_94 = arith.constant 256 : index
    %111 = vector.load %arg11[%c0_92, %c0_93, %c256_94] : memref<1x8x512xf32, #tpu.memory_space<vmem>>, vector<1x8x128xf32>
    %112 = vector.broadcast %97 : vector<1x8x1xf32> to vector<1x8x128xf32>
    %113 = arith.mulf %112, %111 : vector<1x8x128xf32>
    %114 = arith.addf %113, %110 : vector<1x8x128xf32>
    %c0_95 = arith.constant 0 : index
    %c0_96 = arith.constant 0 : index
    %c256_97 = arith.constant 256 : index
    %115 = vector.load %arg11[%c0_95, %c0_96, %c256_97] : memref<1x8x512xf32, #tpu.memory_space<vmem>>, vector<1x8x128xf32>
    tpu.vector_store %arg11[%c0_95, %c0_96, %c256_97], %114 {strides = array<i32>} : memref<1x8x512xf32, #tpu.memory_space<vmem>>, vector<1x8x128xf32>,
    %c2_98 = arith.constant 2 : index
    %c0_99 = arith.constant 0 : index
    %c0_100 = arith.constant 0 : index
    %c0_101 = arith.constant 0 : index
    %116 = vector.load %arg12[%c2_98, %c0_99, %c0_100, %c0_101] : memref<4x1x8x1xf32, #tpu.memory_space<vmem>>, vector<1x1x8x1xf32>
    %117 = vector.shape_cast %116 : vector<1x1x8x1xf32> to vector<1x8x1xf32>
    %118 = vector.shape_cast %95 : vector<1x8x1xf32> to vector<1x1x8x1xf32>
    tpu.vector_store %arg12[%c2_98, %c0_99, %c0_100, %c0_101], %118 {strides = array<i32>} : memref<4x1x8x1xf32, #tpu.memory_space<vmem>>, vector<1x1x8x1xf32>,
    %c0_102 = arith.constant 0 : index
    %c0_103 = arith.constant 0 : index
    %c384 = arith.constant 384 : index
    %119 = vector.load %arg10[%c0_102, %c0_103, %c384] : memref<1x8x512xf32, #tpu.memory_space<vmem>>, vector<1x8x128xf32>
    %120 = vector.extract_strided_slice %14 {offsets = [0, 0, 384], sizes = [1, 8, 128], strides = [1, 1, 1]} : vector<1x8x512xf32> to vector<1x8x128xf32>
    %121 = vector.extract_strided_slice %22 {offsets = [0, 0, 384], sizes = [1, 8, 128], strides = [1, 1, 1]} : vector<1x8x512xf32> to vector<1x8x128xf32>
    %cst_104 = arith.constant dense<0.000000e+00> : vector<1x8x8xf32>
    %122 = tpu.matmul %119, %120, %cst_104 {dimension_numbers = #tpu.dot_dimension_numbers<[2], [2], [1], [1], [0, 0, 0, 1, 1, 1], [0], [0]>} : vector<1x8x128xf32>, vector<1x8x128xf32>, vector<1x8x8xf32> -> vector<1x8x8xf32>
    %c3 = arith.constant 3 : index
    %c0_105 = arith.constant 0 : index
    %c0_106 = arith.constant 0 : index
    %c0_107 = arith.constant 0 : index
    %123 = vector.load %arg12[%c3, %c0_105, %c0_106, %c0_107] : memref<4x1x8x1xf32, #tpu.memory_space<vmem>>, vector<1x1x8x1xf32>
    %124 = vector.shape_cast %123 : vector<1x1x8x1xf32> to vector<1x8x1xf32>
    %cst_108 = arith.constant dense<0xFF800000> : vector<1x8xf32>
    %125 = vector.multi_reduction <maximumf>, %122, %cst_108 [2] : vector<1x8x8xf32> to vector<1x8xf32>
    %126 = vector.shape_cast %125 : vector<1x8xf32> to vector<1x8x1xf32>
    %127 = arith.maximumf %124, %126 : vector<1x8x1xf32>
    %128 = arith.subf %124, %127 : vector<1x8x1xf32>
    %129 = math.exp %128 : vector<1x8x1xf32>
    %130 = vector.broadcast %127 : vector<1x8x1xf32> to vector<1x8x8xf32>
    %131 = arith.subf %122, %130 : vector<1x8x8xf32>
    %132 = math.exp %131 : vector<1x8x8xf32>
    %c3_109 = arith.constant 3 : index
    %c0_110 = arith.constant 0 : index
    %c0_111 = arith.constant 0 : index
    %c0_112 = arith.constant 0 : index
    %133 = vector.load %arg13[%c3_109, %c0_110, %c0_111, %c0_112] : memref<4x1x8x1xf32, #tpu.memory_space<vmem>>, vector<1x1x8x1xf32>
    %134 = vector.shape_cast %133 : vector<1x1x8x1xf32> to vector<1x8x1xf32>
    %135 = arith.mulf %129, %134 : vector<1x8x1xf32>
    %cst_113 = arith.constant dense<0.000000e+00> : vector<1x8xf32>
    %136 = vector.multi_reduction <add>, %132, %cst_113 [2] : vector<1x8x8xf32> to vector<1x8xf32>
    %137 = vector.shape_cast %136 : vector<1x8xf32> to vector<1x8x1xf32>
    %138 = arith.addf %135, %137 : vector<1x8x1xf32>
    %c3_114 = arith.constant 3 : index
    %c0_115 = arith.constant 0 : index
    %c0_116 = arith.constant 0 : index
    %c0_117 = arith.constant 0 : index
    %139 = vector.load %arg13[%c3_114, %c0_115, %c0_116, %c0_117] : memref<4x1x8x1xf32, #tpu.memory_space<vmem>>, vector<1x1x8x1xf32>
    %140 = vector.shape_cast %139 : vector<1x1x8x1xf32> to vector<1x8x1xf32>
    %141 = vector.shape_cast %138 : vector<1x8x1xf32> to vector<1x1x8x1xf32>
    tpu.vector_store %arg13[%c3_114, %c0_115, %c0_116, %c0_117], %141 {strides = array<i32>} : memref<4x1x8x1xf32, #tpu.memory_space<vmem>>, vector<1x1x8x1xf32>,
    %cst_118 = arith.constant dense<0.000000e+00> : vector<1x8x128xf32>
    %142 = tpu.matmul %132, %121, %cst_118 {dimension_numbers = #tpu.dot_dimension_numbers<[2], [1], [1], [2], [0, 0, 0, 1, 1, 2], [0], [0]>} : vector<1x8x8xf32>, vector<1x8x128xf32>, vector<1x8x128xf32> -> vector<1x8x128xf32>
    %c0_119 = arith.constant 0 : index
    %c0_120 = arith.constant 0 : index
    %c384_121 = arith.constant 384 : index
    %143 = vector.load %arg11[%c0_119, %c0_120, %c384_121] : memref<1x8x512xf32, #tpu.memory_space<vmem>>, vector<1x8x128xf32>
    %144 = vector.broadcast %129 : vector<1x8x1xf32> to vector<1x8x128xf32>
    %145 = arith.mulf %144, %143 : vector<1x8x128xf32>
    %146 = arith.addf %145, %142 : vector<1x8x128xf32>
    %c0_122 = arith.constant 0 : index
    %c0_123 = arith.constant 0 : index
    %c384_124 = arith.constant 384 : index
    %147 = vector.load %arg11[%c0_122, %c0_123, %c384_124] : memref<1x8x512xf32, #tpu.memory_space<vmem>>, vector<1x8x128xf32>
    tpu.vector_store %arg11[%c0_122, %c0_123, %c384_124], %146 {strides = array<i32>} : memref<1x8x512xf32, #tpu.memory_space<vmem>>, vector<1x8x128xf32>,
    %c3_125 = arith.constant 3 : index
    %c0_126 = arith.constant 0 : index
    %c0_127 = arith.constant 0 : index
    %c0_128 = arith.constant 0 : index
    %148 = vector.load %arg12[%c3_125, %c0_126, %c0_127, %c0_128] : memref<4x1x8x1xf32, #tpu.memory_space<vmem>>, vector<1x1x8x1xf32>
    %149 = vector.shape_cast %148 : vector<1x1x8x1xf32> to vector<1x8x1xf32>
    %150 = vector.shape_cast %127 : vector<1x8x1xf32> to vector<1x1x8x1xf32>
    tpu.vector_store %arg12[%c3_125, %c0_126, %c0_127, %c0_128], %150 {strides = array<i32>} : memref<4x1x8x1xf32, #tpu.memory_space<vmem>>, vector<1x1x8x1xf32>,
    %c0_i32_129 = arith.constant 0 : i32
    %151 = arith.cmpi eq, %arg1, %c0_i32_129 : i32
    %152 = arith.extui %151 : i1 to i32
    %c0_i32_130 = arith.constant 0 : i32
    %153 = arith.cmpi ne, %152, %c0_i32_130 : i32
    scf.if %153 {
      %c0_131 = arith.constant 0 : index
      %c0_132 = arith.constant 0 : index
      %c0_133 = arith.constant 0 : index
      %c0_134 = arith.constant 0 : index
      %154 = vector.load %arg13[%c0_131, %c0_132, %c0_133, %c0_134] : memref<4x1x8x1xf32, #tpu.memory_space<vmem>>, vector<1x1x8x1xf32>
      %155 = vector.shape_cast %154 : vector<1x1x8x1xf32> to vector<1x8x1xf32>
      %156 = tpu.reciprocal %155 {approx = true} : vector<1x8x1xf32> -> vector<1x8x1xf32>
      %157 = arith.mulf %155, %156 : vector<1x8x1xf32>
      %cst_135 = arith.constant 2.000000e+00 : f32
      %158 = vector.broadcast %cst_135 : f32 to vector<1x8x1xf32>
      %159 = arith.subf %158, %157 : vector<1x8x1xf32>
      %160 = arith.mulf %156, %159 : vector<1x8x1xf32>
      %c0_136 = arith.constant 0 : index
      %c0_137 = arith.constant 0 : index
      %c0_138 = arith.constant 0 : index
      %161 = vector.load %arg11[%c0_136, %c0_137, %c0_138] : memref<1x8x512xf32, #tpu.memory_space<vmem>>, vector<1x8x128xf32>
      %162 = vector.broadcast %160 : vector<1x8x1xf32> to vector<1x8x128xf32>
      %163 = arith.mulf %161, %162 : vector<1x8x128xf32>
      %c0_139 = arith.constant 0 : index
      %c0_140 = arith.constant 0 : index
      %c0_141 = arith.constant 0 : index
      %164 = vector.load %arg11[%c0_139, %c0_140, %c0_141] : memref<1x8x512xf32, #tpu.memory_space<vmem>>, vector<1x8x128xf32>
      tpu.vector_store %arg11[%c0_139, %c0_140, %c0_141], %163 {strides = array<i32>} : memref<1x8x512xf32, #tpu.memory_space<vmem>>, vector<1x8x128xf32>,
      %c1_142 = arith.constant 1 : index
      %c0_143 = arith.constant 0 : index
      %c0_144 = arith.constant 0 : index
      %c0_145 = arith.constant 0 : index
      %165 = vector.load %arg13[%c1_142, %c0_143, %c0_144, %c0_145] : memref<4x1x8x1xf32, #tpu.memory_space<vmem>>, vector<1x1x8x1xf32>
      %166 = vector.shape_cast %165 : vector<1x1x8x1xf32> to vector<1x8x1xf32>
      %167 = tpu.reciprocal %166 {approx = true} : vector<1x8x1xf32> -> vector<1x8x1xf32>
      %168 = arith.mulf %166, %167 : vector<1x8x1xf32>
      %cst_146 = arith.constant 2.000000e+00 : f32
      %169 = vector.broadcast %cst_146 : f32 to vector<1x8x1xf32>
      %170 = arith.subf %169, %168 : vector<1x8x1xf32>
      %171 = arith.mulf %167, %170 : vector<1x8x1xf32>
      %c0_147 = arith.constant 0 : index
      %c0_148 = arith.constant 0 : index
      %c128_149 = arith.constant 128 : index
      %172 = vector.load %arg11[%c0_147, %c0_148, %c128_149] : memref<1x8x512xf32, #tpu.memory_space<vmem>>, vector<1x8x128xf32>
      %173 = vector.broadcast %171 : vector<1x8x1xf32> to vector<1x8x128xf32>
      %174 = arith.mulf %172, %173 : vector<1x8x128xf32>
      %c0_150 = arith.constant 0 : index
      %c0_151 = arith.constant 0 : index
      %c128_152 = arith.constant 128 : index
      %175 = vector.load %arg11[%c0_150, %c0_151, %c128_152] : memref<1x8x512xf32, #tpu.memory_space<vmem>>, vector<1x8x128xf32>
      tpu.vector_store %arg11[%c0_150, %c0_151, %c128_152], %174 {strides = array<i32>} : memref<1x8x512xf32, #tpu.memory_space<vmem>>, vector<1x8x128xf32>,
      %c2_153 = arith.constant 2 : index
      %c0_154 = arith.constant 0 : index
      %c0_155 = arith.constant 0 : index
      %c0_156 = arith.constant 0 : index
      %176 = vector.load %arg13[%c2_153, %c0_154, %c0_155, %c0_156] : memref<4x1x8x1xf32, #tpu.memory_space<vmem>>, vector<1x1x8x1xf32>
      %177 = vector.shape_cast %176 : vector<1x1x8x1xf32> to vector<1x8x1xf32>
      %178 = tpu.reciprocal %177 {approx = true} : vector<1x8x1xf32> -> vector<1x8x1xf32>
      %179 = arith.mulf %177, %178 : vector<1x8x1xf32>
      %cst_157 = arith.constant 2.000000e+00 : f32
      %180 = vector.broadcast %cst_157 : f32 to vector<1x8x1xf32>
      %181 = arith.subf %180, %179 : vector<1x8x1xf32>
      %182 = arith.mulf %178, %181 : vector<1x8x1xf32>
      %c0_158 = arith.constant 0 : index
      %c0_159 = arith.constant 0 : index
      %c256_160 = arith.constant 256 : index
      %183 = vector.load %arg11[%c0_158, %c0_159, %c256_160] : memref<1x8x512xf32, #tpu.memory_space<vmem>>, vector<1x8x128xf32>
      %184 = vector.broadcast %182 : vector<1x8x1xf32> to vector<1x8x128xf32>
      %185 = arith.mulf %183, %184 : vector<1x8x128xf32>
      %c0_161 = arith.constant 0 : index
      %c0_162 = arith.constant 0 : index
      %c256_163 = arith.constant 256 : index
      %186 = vector.load %arg11[%c0_161, %c0_162, %c256_163] : memref<1x8x512xf32, #tpu.memory_space<vmem>>, vector<1x8x128xf32>
      tpu.vector_store %arg11[%c0_161, %c0_162, %c256_163], %185 {strides = array<i32>} : memref<1x8x512xf32, #tpu.memory_space<vmem>>, vector<1x8x128xf32>,
      %c3_164 = arith.constant 3 : index
      %c0_165 = arith.constant 0 : index
      %c0_166 = arith.constant 0 : index
      %c0_167 = arith.constant 0 : index
      %187 = vector.load %arg13[%c3_164, %c0_165, %c0_166, %c0_167] : memref<4x1x8x1xf32, #tpu.memory_space<vmem>>, vector<1x1x8x1xf32>
      %188 = vector.shape_cast %187 : vector<1x1x8x1xf32> to vector<1x8x1xf32>
      %189 = tpu.reciprocal %188 {approx = true} : vector<1x8x1xf32> -> vector<1x8x1xf32>
      %190 = arith.mulf %188, %189 : vector<1x8x1xf32>
      %cst_168 = arith.constant 2.000000e+00 : f32
      %191 = vector.broadcast %cst_168 : f32 to vector<1x8x1xf32>
      %192 = arith.subf %191, %190 : vector<1x8x1xf32>
      %193 = arith.mulf %189, %192 : vector<1x8x1xf32>
      %c0_169 = arith.constant 0 : index
      %c0_170 = arith.constant 0 : index
      %c384_171 = arith.constant 384 : index
      %194 = vector.load %arg11[%c0_169, %c0_170, %c384_171] : memref<1x8x512xf32, #tpu.memory_space<vmem>>, vector<1x8x128xf32>
      %195 = vector.broadcast %193 : vector<1x8x1xf32> to vector<1x8x128xf32>
      %196 = arith.mulf %194, %195 : vector<1x8x128xf32>
      %c0_172 = arith.constant 0 : index
      %c0_173 = arith.constant 0 : index
      %c384_174 = arith.constant 384 : index
      %197 = vector.load %arg11[%c0_172, %c0_173, %c384_174] : memref<1x8x512xf32, #tpu.memory_space<vmem>>, vector<1x8x128xf32>
      tpu.vector_store %arg11[%c0_172, %c0_173, %c384_174], %196 {strides = array<i32>} : memref<1x8x512xf32, #tpu.memory_space<vmem>>, vector<1x8x128xf32>,
      %c0_175 = arith.constant 0 : index
      %c0_176 = arith.constant 0 : index
      %c0_177 = arith.constant 0 : index
      %198 = vector.load %arg11[%c0_175, %c0_176, %c0_177] : memref<1x8x512xf32, #tpu.memory_space<vmem>>, vector<1x8x512xf32>
      %199 = vector.shape_cast %198 : vector<1x8x512xf32> to vector<8x512xf32>
      %c0_178 = arith.constant 0 : index
      %c0_179 = arith.constant 0 : index
      %200 = vector.load %arg7[%c0_178, %c0_179] : memref<512x32xf32, #tpu.memory_space<vmem>>, vector<512x32xf32>
      %cst_180 = arith.constant dense<0.000000e+00> : vector<8x32xf32>
      %201 = tpu.matmul %199, %200, %cst_180 {dimension_numbers = #tpu.dot_dimension_numbers<[1], [0], [0], [1], [0, 0, 1, 1], [], []>} : vector<8x512xf32>, vector<512x32xf32>, vector<8x32xf32> -> vector<8x32xf32>
      %c0_181 = arith.constant 0 : index
      %c0_182 = arith.constant 0 : index
      %202 = vector.load %arg8[%c0_181, %c0_182] : memref<1x32xf32, #tpu.memory_space<vmem>>, vector<1x32xf32>
      %203 = vector.broadcast %202 : vector<1x32xf32> to vector<8x32xf32>
      %204 = arith.addf %201, %203 : vector<8x32xf32>
      %205 = vector.shape_cast %204 : vector<8x32xf32> to vector<1x8x32xf32>
      %c0_183 = arith.constant 0 : index
      %c0_184 = arith.constant 0 : index
      %c0_185 = arith.constant 0 : index
      %206 = vector.load %arg9[%c0_183, %c0_184, %c0_185] : memref<1x8x32xf32, #tpu.memory_space<vmem>>, vector<1x8x32xf32>
      tpu.vector_store %arg9[%c0_183, %c0_184, %c0_185], %205 {strides = array<i32>} : memref<1x8x32xf32, #tpu.memory_space<vmem>>, vector<1x8x32xf32>,
    } else {
    }
    return
  }
  func.func @transform_0(%arg0: i32, %arg1: i32) -> (i32, i32, i32) {
    %c0_i32 = arith.constant 0 : i32
    %c0_i32_0 = arith.constant 0 : i32
    %c0_i32_1 = arith.constant 0 : i32
    return %arg0, %c0_i32, %c0_i32_0 : i32, i32, i32
  }
  func.func @transform_1(%arg0: i32, %arg1: i32) -> (i32, i32, i32) {
    %c0_i32 = arith.constant 0 : i32
    %c0_i32_0 = arith.constant 0 : i32
    return %arg0, %arg1, %c0_i32 : i32, i32, i32
  }
  func.func @transform_2(%arg0: i32, %arg1: i32) -> (i32, i32, i32) {
    %c0_i32 = arith.constant 0 : i32
    %c0_i32_0 = arith.constant 0 : i32
    return %arg0, %arg1, %c0_i32 : i32, i32, i32
  }
  func.func @transform_3(%arg0: i32, %arg1: i32) -> (i32, i32, i32) {
    %c0_i32 = arith.constant 0 : i32
    %c0_i32_0 = arith.constant 0 : i32
    %c0_i32_1 = arith.constant 0 : i32
    %c0_i32_2 = arith.constant 0 : i32
    return %c0_i32, %c0_i32_0, %c0_i32_1 : i32, i32, i32
  }
  func.func @transform_4(%arg0: i32, %arg1: i32) -> (i32, i32, i32) {
    %c0_i32 = arith.constant 0 : i32
    %c0_i32_0 = arith.constant 0 : i32
    %c0_i32_1 = arith.constant 0 : i32
    %c0_i32_2 = arith.constant 0 : i32
    return %c0_i32, %c0_i32_0, %c0_i32_1 : i32, i32, i32
  }
  func.func @transform_5(%arg0: i32, %arg1: i32) -> (i32, i32) {
    %c0_i32 = arith.constant 0 : i32
    %c0_i32_0 = arith.constant 0 : i32
    %c0_i32_1 = arith.constant 0 : i32
    return %c0_i32, %c0_i32_0 : i32, i32
  }
  func.func @transform_6(%arg0: i32, %arg1: i32) -> (i32, i32) {
    %c0_i32 = arith.constant 0 : i32
    %c0_i32_0 = arith.constant 0 : i32
    %c0_i32_1 = arith.constant 0 : i32
    return %c0_i32, %c0_i32_0 : i32, i32
  }
  func.func @transform_7(%arg0: i32, %arg1: i32) -> (i32, i32, i32) {
    %c0_i32 = arith.constant 0 : i32
    %c0_i32_0 = arith.constant 0 : i32
    %c0_i32_1 = arith.constant 0 : i32
    return %arg0, %c0_i32, %c0_i32_0 : i32, i32, i32
  }
}

</mosaic_0001>

<bundles_post_ra>
// kernel: tpu_custom_call.1
= control target key start
LH: loop header
LB: loop body
LE: loop exit
PB: predicated region body
PF: predicated region fallthrough
CT: control target
= control target key end

     0   :  { %12 = vsyncpa [#allocation7], 0  ;;  %s3134_s0 = inlined_call_operand.vmem [shape: f32[2,8,32], index: 0, kind: input, shape index: {}]   ;;  %s3135_s1 = inlined_call_operand.vmem [shape: f32[2,8,32], index: 1, kind: input, shape index: {}]   ;;  %s3136_s2 = inlined_call_operand.vmem [shape: f32[2,8,32], index: 2, kind: input, shape index: {}]   ;;  %s3137_s3 = inlined_call_operand.vmem [shape: f32[3,32,512], index: 3, kind: input, shape index: {}]   ;;  %s3138_s4 = inlined_call_operand.vmem [shape: f32[3,1,512], index: 4, kind: input, shape index: {}]   ;;  %s3139_s5 = inlined_call_operand.vmem [shape: f32[512,32], index: 5, kind: input, shape index: {}]   ;;  %s3140_s6 = inlined_call_operand.vmem [shape: f32[1,32], index: 6, kind: input, shape index: {}]   ;;  %s3141_s7 = inlined_call_operand.hbm [shape: f32[2,8,32], index: 7, kind: output, shape index: {}]  }
   0x1   :  { %14 = vsyncpa [#allocation7 + $0x1], 0  ;;  %s2529_s24 = smov 0   ;;  %s2531_s25 = smov 0  }
   0x2   :  { %s2533_s26 = smov 0   ;;  %s2535_s27 = smov 0  }
   0x3   :  { %s2537_s28 = smov 0   ;;  %s2539_s29 = smov 0  }
   0x4 LB: > { %s2023_s30 = sadd.s32 4294967295, %s2482_s29   ;;  %s2024_s8 = sadd.s32 4294967294, %s2482_s29   ;;  %s2482_s29 = sphi %s2539_s29, %s20_s29   ;;  %s2478_s28 = sphi %s2537_s28, %s3148_s28   ;;  %s2474_s27 = sphi %s2535_s27, %s3147_s27   ;;  %s2470_s26 = sphi %s2533_s26, %s3146_s26   ;;  %s2466_s25 = sphi %s2531_s25, %s3145_s25   ;;  %s2462_s24 = sphi %s2529_s24, %s3144_s24  }
   0x5   : > { %s32_s9 = sadd.s32 1, %s2478_s28  ;;  %s205_s10 = sadd.s32 1, %s2470_s26 }
   0x6   : > { %p34_p0 = scmp.ge.s32.totalorder %s32_s9, 2  ;;  %p215_p1 = scmp.ne.s32.totalorder %s2470_s26, %s2466_s25 }
   0x7   : > { %p216_p2 = scmp.eq.s32.totalorder %s2023_s30, 1  ;;  %p221_p3 = scmp.ne.s32.totalorder %s2466_s25, %s2462_s24 }
   0x8   : > { %s3150_s9 = smov (%p34_p0, %s32_s9), 0  ;;  %p222_p5 = scmp.eq.s32.totalorder %s2024_s8, 1 }
   0x9   : > { %p2569_p4 = por %p216_p2, %p215_p1  ;;  %s202_s12 = ssub.s32 %s2478_s28, %s3150_s9 }
   0xa   : > { %p2027_p6 = scmp.ge.s32.totalorder %s2482_s29, 1  ;;  %p203_p7 = scmp.eq.s32.totalorder %s202_s12, 0 }
   0xb   : > { %p2576_p8 = por %p222_p5, %p221_p3  ;;  %p279_p9 = scmp.lt.s32.totalorder %s2482_s29, 3 }
   0xc   : > { %s2582_s14 = scalar_select %p203_p7, %s2470_s26, %s205_s10  }
   0xd   : > { %p280_p10 = pnand %p2027_p6, %p279_p9 }
   0xe   : > { %v348_v0 = vld [vmem:[%s3137_s3 + $0x8] sm:$0xff] (!%p280_p10)  ;;  %v347_v2 = vld [vmem:[%s3137_s3] sm:$0xff] (!%p280_p10)  ;;  %p324_p11 = scmp.lt.s32.totalorder (!%p280_p10), %s2474_s27, 1  ;;  %v2484_v7 = vmov (!%p280_p10), 0.0   ;;  %v350_v12 = vld [vmem:[%s3137_s3 + $0x18] sm:$0xff] (!%p280_p10)  ;;  %vm385_vm0 = vcmask (!%p280_p10), 261120  }
   0xf   : > { %283 = sbr.rel (%p280_p10) target bundleno = 1299 (0x513), region = 48  ;;  %v352_v1 = vld [vmem:[%s3137_s3 + $0x28] sm:$0xff] (!%p280_p10)  ;;  %v351_v4 = vld [vmem:[%s3137_s3 + $0x20] sm:$0xff] (!%p280_p10)  ;;  %453 = vmatprep.mubr.f32.mxu0 (!%p280_p10), %v2484_v7  ;;  %524 = vmatprep.mubr.f32.mxu1 (!%p280_p10), %v2484_v7  ;;  %v354_v13 = vld [vmem:[%s3137_s3 + $0x38] sm:$0xff] (!%p280_p10)  ;;  %vm2485_vm1 = vmmov (!%p280_p10), 0   ;;  %vm539_vm2 = vcmask (!%p280_p10), 7168  }
  0x10   : > { %v2207_v3 = vpack.c.bf16 (!%p280_p10), %v352_v1, %v348_v0  ;;  %v356_v5 = vld [vmem:[%s3137_s3 + $0x48] sm:$0xff] (!%p280_p10)  ;;  %v2209_v8 = vpack.c.bf16 (!%p280_p10), %v351_v4, %v347_v2  ;;  %v355_v10 = vld [vmem:[%s3137_s3 + $0x40] sm:$0xff] (!%p280_p10)  ;;  %v349_v14 = vld [vmem:[%s3137_s3 + $0x10] sm:$0xff] (!%p280_p10)  ;;  %v2215_v17 = vpack.c.bf16 (!%p280_p10), %v354_v13, %v350_v12  ;;  %v365_v13 = vlaneseq (!%p280_p10)  ;;  %544 = vst.msk [vmem:[#allocation5] sm:$0xff] (!%p280_p10), %vm539_vm2, %v2484_v7  ;;  %s321_s15 = sand.u32 (!%p280_p10), 1, %s2466_s25   ;;  %s2078_s18 = sshll.u32 (!%p280_p10), %s2474_s27, 7 }
  0x11   : > { %v360_v6 = vld [vmem:[%s3137_s3 + $0x68] sm:$0xff] (!%p280_p10)  ;;  %v359_v11 = vld [vmem:[%s3137_s3 + $0x60] sm:$0xff] (!%p280_p10)  ;;  %v353_v15 = vld [vmem:[%s3137_s3 + $0x30] sm:$0xff] (!%p280_p10)  ;;  %545 = vst.msk [vmem:[#allocation5 + $0x8] sm:$0xff] (!%p280_p10), %vm539_vm2, %v2484_v7  ;;  %vm997_vm3 = vcmask (!%p280_p10), 64512   ;;  %s2028_s16 = sshll.u32 (!%p280_p10), %s321_s15, 3  ;;  %s3086_s30 = scalar_lea.hbm (!%p280_p10), %s3141_s7, %s2078_s18 }
  0x12   : > { %v2211_v9 = vpack.c.bf16 (!%p280_p10), %v360_v6, %v356_v5  ;;  %2208 = vmatprep.subr.bf16.mxu0 (!%p280_p10), %v2207_v3  ;;  %v2213_v16 = vpack.c.bf16 (!%p280_p10), %v359_v11, %v355_v10  ;;  %v2217_v18 = vpack.c.bf16 (!%p280_p10), %v353_v15, %v349_v14  ;;  %v2035_v19 = vld [vmem:[%s3137_s3 + $0x88] sm:$0xff] (!%p280_p10)  ;;  %v2034_v21 = vld [vmem:[%s3137_s3 + $0x80] sm:$0xff] (!%p280_p10)  ;;  %v358_v24 = vld [vmem:[%s3137_s3 + $0x58] sm:$0xff] (!%p280_p10)  ;;  %2216 = vmatprep.subr.bf16.mxu1 (!%p280_p10), %v2215_v17  ;;  %v366_v14 = vshrl.u32 (!%p280_p10), %v365_v13, 7  ;;  %s1913_s8 = scalar_lea.sflag (!%p280_p10), [#allocation7], %s321_s15 }
  0x13   : > { %2210 = vmatpush1.bf16.msra.mxu0 (!%p280_p10), %v2209_v8  ;;  %v2039_v20 = vld [vmem:[%s3137_s3 + $0xa8] sm:$0xff] (!%p280_p10)  ;;  %v2038_v23 = vld [vmem:[%s3137_s3 + $0xa0] sm:$0xff] (!%p280_p10)  ;;  %v362_v25 = vld [vmem:[%s3137_s3 + $0x78] sm:$0xff] (!%p280_p10)  ;;  %546 = vst.msk [vmem:[#allocation5 + $0x10] sm:$0xff] (!%p280_p10), %vm539_vm2, %v2484_v7 }
  0x14   : > { %2212 = vmatprep.subr.bf16.mxu0 (!%p280_p10), %v2211_v9  ;;  %v2223_v22 = vpack.c.bf16 (!%p280_p10), %v2039_v20, %v2035_v19  ;;  %v2219_v26 = vpack.c.bf16 (!%p280_p10), %v362_v25, %v358_v24  ;;  %v357_v27 = vld [vmem:[%s3137_s3 + $0x50] sm:$0xff] (!%p280_p10)  ;;  %2218 = vmatpush1.bf16.msra.mxu1 (!%p280_p10), %v2217_v18  ;;  %v2043_v31 = vld [vmem:[%s3137_s3 + $0xc8] sm:$0xff] (!%p280_p10)  ;;  %v2225_v33 = vpack.c.bf16 (!%p280_p10), %v2038_v23, %v2034_v21  ;;  %v2042_v34 = vld [vmem:[%s3137_s3 + $0xc0] sm:$0xff] (!%p280_p10)  ;;  %v367_v15 = vsub.s32 (!%p280_p10), 0, %v366_v14 }
  0x15   : > { %v361_v28 = vld [vmem:[%s3137_s3 + $0x70] sm:$0xff] (!%p280_p10)  ;;  %v2047_v32 = vld [vmem:[%s3137_s3 + $0xe8] sm:$0xff] (!%p280_p10)  ;;  %v2037_v35 = vld [vmem:[%s3137_s3 + $0x98] sm:$0xff] (!%p280_p10)  ;;  %547 = vst.msk [vmem:[#allocation5 + $0x18] sm:$0xff] (!%p280_p10), %vm539_vm2, %v2484_v7 }
  0x16   : > { %s325_s20 = scalar_select %p324_p11, %s2474_s27, 1  ;;  %v2221_v30 = vpack.c.bf16 %v361_v28, %v357_v27  ;;  %2220 = vmatprep.subr.bf16.mxu1 %v2219_v26  ;;  %v2041_v36 = vld [vmem:[%s3137_s3 + $0xb8] sm:$0xff]  ;;  %v2227_v37 = vpack.c.bf16 %v2047_v32, %v2043_v31  ;;  %v2046_v38 = vld [vmem:[%s3137_s3 + $0xe0] sm:$0xff]  ;;  %v2036_v40 = vld [vmem:[%s3137_s3 + $0x90] sm:$0xff]  ;;  %v2771_v27 = vsub.s32 2, %v366_v14 }
  0x17   : > { %2214 = vmatpush1.bf16.msra.mxu0 %v2213_v16  ;;  %v2231_v39 = vpack.c.bf16 %v2041_v36, %v2037_v35  ;;  %v2040_v41 = vld [vmem:[%s3137_s3 + $0xb0] sm:$0xff]  ;;  %v2045_v42 = vld [vmem:[%s3137_s3 + $0xd8] sm:$0xff]  ;;  %v2054_v45 = vld [vmem:[%s3137_s3 + $0x108] sm:$0xff]  ;;  %v2229_v47 = vpack.c.bf16 %v2046_v38, %v2042_v34  ;;  %s2488_s27 = smov [#allocation6]  }
  0x18   : > { %s2624_s12 = sshll.u32 %s325_s20, 3  ;;  %2224 = vmatprep.subr.bf16.mxu0 %v2223_v22  ;;  %v2049_v43 = vld [vmem:[%s3137_s3 + $0xf8] sm:$0xff]  ;;  %2222 = vmatpush1.bf16.msra.mxu1 %v2221_v30  ;;  %v2233_v44 = vpack.c.bf16 %v2040_v41, %v2036_v40  ;;  %v2058_v46 = vld [vmem:[%s3137_s3 + $0x128] sm:$0xff]  ;;  %v2044_v49 = vld [vmem:[%s3137_s3 + $0xd0] sm:$0xff]  ;;  %v2768_v22 = vsub.s32 1, %v366_v14 }
  0x19   : > { %s327_s20 = scalar_lea.vmem %s3134_s0, %s2624_s12  ;;  %v2235_v48 = vpack.c.bf16 %v2049_v43, %v2045_v42  ;;  %v2048_v50 = vld [vmem:[%s3137_s3 + $0xf0] sm:$0xff]  ;;  %2232 = vmatprep.subr.bf16.mxu1 %v2231_v39  ;;  %s334_s17 = scalar_lea.vmem %s3135_s1, %s2624_s12  ;;  %v2239_v51 = vpack.c.bf16 %v2058_v46, %v2054_v45  ;;  %v2053_v52 = vld [vmem:[%s3137_s3 + $0x100] sm:$0xff]  ;;  %v2062_v57 = vld [vmem:[%s3137_s3 + $0x148] sm:$0xff] }
  0x1a   : > { %v346_v29 = vld [vmem:[%s327_s20] sm:$0xff]  ;;  %v2237_v54 = vpack.c.bf16 %v2048_v50, %v2044_v49  ;;  %v2066_v58 = vld [vmem:[%s3137_s3 + $0x168] sm:$0xff]  ;;  %s341_s19 = scalar_lea.vmem %s3136_s2, %s2624_s12  ;;  %v2056_v0 = vld [vmem:[%s3137_s3 + $0x118] sm:$0xff]  ;;  %s2408_s12 = sshll.u32 %s2488_s27, 4  ;;  %s2409_s12 = int_to_ptr.vmem [resolvable:$false] %s2408_s12 }
  0x1b   : > { %2032 = vmatmul.mubr.msk.f32.vlgmr.msra.gmra.mrb[0].mxu0 %vm385_vm0, %v346_v29  ;;  %v2057_v53 = vld [vmem:[%s3137_s3 + $0x120] sm:$0xff]  ;;  %2033 = vmatmul.mubr.msk.f32.vlgmr.msra.gmra.mrb[0].mxu1 %vm385_vm0, %v346_v29  ;;  %v2243_v59 = vpack.c.bf16 %v2066_v58, %v2062_v57  ;;  %v2060_v1 = vld [vmem:[%s3137_s3 + $0x138] sm:$0xff]  ;;  %v2055_v2 = vld [vmem:[%s3137_s3 + $0x110] sm:$0xff] }
  0x1c   : > { %2226 = vmatpush1.bf16.msra.mxu0 %v2225_v33  ;;  %662 = vmatprep.mubr.f32.mxu0 %v2484_v7  ;;  %v552_v55 = vld [vmem:[%s334_s17] sm:$0xff]  ;;  %v2241_v56 = vpack.c.bf16 %v2057_v53, %v2053_v52  ;;  %v2247_v3 = vpack.c.bf16 %v2060_v1, %v2056_v0  ;;  %v2059_v4 = vld [vmem:[%s3137_s3 + $0x130] sm:$0xff]  ;;  %v2064_v5 = vld [vmem:[%s3137_s3 + $0x158] sm:$0xff] }
  0x1d   : > { %2228 = vmatprep.subr.bf16.mxu0 %v2227_v37  ;;  %2234 = vmatpush1.bf16.msra.mxu1 %v2233_v44  ;;  %v2061_v60 = vld [vmem:[%s3137_s3 + $0x140] sm:$0xff]  ;;  %v2068_v6 = vld [vmem:[%s3137_s3 + $0x178] sm:$0xff]  ;;  %v2249_v8 = vpack.c.bf16 %v2059_v4, %v2055_v2  ;;  %v2063_v10 = vld [vmem:[%s3137_s3 + $0x150] sm:$0xff]  ;;  %v2776_v37 = vsub.s32 3, %v366_v14 }
  0x1e   : > { %733 = vmatprep.mubr.f32.mxu1 %v2484_v7  ;;  %2236 = vmatprep.subr.bf16.mxu1 %v2235_v48  ;;  %v2065_v61 = vld [vmem:[%s3137_s3 + $0x160] sm:$0xff]  ;;  %v2251_v9 = vpack.c.bf16 %v2068_v6, %v2064_v5  ;;  %v2067_v11 = vld [vmem:[%s3137_s3 + $0x170] sm:$0xff]  ;;  %v2792_v49 = vld [vmem:[%s3138_s4 + $0x8] sm:$0xf] }
  0x1f   : > { %v2245_v62 = vpack.c.bf16 %v2065_v61, %v2061_v60  ;;  %v553_v63 = vld [vmem:[%s341_s19] sm:$0xff]  ;;  %v2253_v12 = vpack.c.bf16 %v2067_v11, %v2063_v10  ;;  %v763_v50 = vrot.slane %v2792_v49, %v367_v15  ;;  %s323_s19 = scalar_lea.vmem [#allocation6], %s2028_s16  ;;  %s2410_s16 = scalar_lea.vmem %s2409_s12, 256 }
  0x20   : > { %2230 = vmatpush1.bf16.msra.mxu0 %v2229_v47  ;;  %v363_v17 = vld [vmem:[%s3138_s4] sm:$0xf]  ;;  %v2050_v19 = vld [vmem:[%s3138_s4 + $0x4] sm:$0xf]  ;;  %s1926_s21 = sshll.u32 %s323_s19, 4  ;;  %s3088_s21 = int_to_ptr.vmem [resolvable:$true] %s1926_s21 }
  0x21   : > { %2240 = vmatprep.subr.bf16.mxu0 %v2239_v51  ;;  %2238 = vmatpush1.bf16.msra.mxu1 %v2237_v54  ;;  %v368_v21 = vrot.slane %v363_v17, %v367_v15  ;;  %v577_v24 = vrot.slane %v2050_v19, %v367_v15  ;;  %v372_v26 = vrot.slane %v363_v17, %v2768_v22  ;;  %v2486_v54 = vmov -inf   ;;  %s2404_s10 = scalar_lea.vmem %s3088_s21, 128  ;;  %p2411_p1 = scmp.lt.s32.totalorder %s3088_s21, %s2409_s12 }
  0x22   : > { %2248 = vmatprep.subr.bf16.mxu1 %v2247_v3  ;;  %v581_v30 = vrot.slane %v2050_v19, %v2768_v22  ;;  %v585_v32 = vrot.slane %v2050_v19, %v2771_v27  ;;  %v376_v36 = vrot.slane %v363_v17, %v2771_v27  ;;  %v380_v43 = vrot.slane %v363_v17, %v2776_v37  ;;  %p2405_p12 = scmp.ne.s32.totalorder %s3088_s21, %s2404_s10  ;;  %p2412_p2 = scmp.lt.s32.totalorder %s2410_s16, %s2404_s10 }
  0x23   : > { %2051 = vmatmul.mubr.msk.f32.vlgmr.msra.gmra.mrb[2].mxu0 %vm385_vm0, %v552_v55  ;;  %v589_v44 = vrot.slane %v2050_v19, %v2776_v37  ;;  %540 = vst.msk [vmem:[#allocation4] sm:$0xff] %vm539_vm2, %v2486_v54  ;;  %541 = vst.msk [vmem:[#allocation4 + $0x8] sm:$0xff] %vm539_vm2, %v2486_v54  ;;  %v2487_v3 = vmov 0  }
  0x24   : > { %2242 = vmatpush1.bf16.msra.mxu0 %v2241_v56  ;;  %847 = vmatprep.mubr.f32.mxu0 %v2484_v7  ;;  %542 = vst.msk [vmem:[#allocation4 + $0x10] sm:$0xff] %vm539_vm2, %v2486_v54  ;;  %543 = vst.msk [vmem:[#allocation4 + $0x18] sm:$0xff] %vm539_vm2, %v2486_v54  ;;  %p2406_p13 = pnand %p2405_p12, %p2569_p4  ;;  %p2413_p3 = por %p2412_p2, %p2411_p1 }
  0x25   : > { %2052 = vmatmul.mubr.msk.f32.vlgmr.msra.gmra.mrb[2].mxu1 %vm385_vm0, %v552_v55  ;;  %2244 = vmatprep.subr.bf16.mxu0 %v2243_v59 }
  0x26   : > { %918 = vmatprep.mubr.f32.mxu1 %v2484_v7  ;;  %2250 = vmatpush1.bf16.msra.mxu1 %v2249_v8  ;;  %p2407_p0 = pneg %p2406_p13 }
  0x27   : > { %2252 = vmatprep.subr.bf16.mxu1 %v2251_v9  ;;  %2378 = vset.pattern.permute.xlu0 %v2487_v3 }
  0x28   : > { %2246 = vmatpush1.bf16.msra.mxu0 %v2245_v62  ;;  %2379 = vset.pattern.permute.xlu1 %v2487_v3  ;;  %v1720_v3 = vld [vmem:[%s3139_s5 + $0xa0] sm:$0xff]  ;;  %p2414_p5 = pnand %p2413_p3, %p2407_p0 }
  0x29   : > { %2167 = vmatprep.subr.mxu0 %v2484_v7 }
  0x2a   : > { %2254 = vmatpush1.bf16.msra.mxu1 %v2253_v12  ;;  %v2814_v4 = vld [vmem:[#allocation4] sm:$0xff]  ;;  %v2817_v8 = vld [vmem:[#allocation4 + $0x8] sm:$0xff] }
  0x2b   : > { %2070 = vmatmul.mubr.msk.f32.vlgmr.msra.gmra.mrb[4].mxu0 %vm385_vm0, %v553_v63  ;;  %2172 = vmatprep.subr.mxu1 %v2484_v7  ;;  %v2824_v12 = vld [vmem:[#allocation4 + $0x10] sm:$0xff] }
  0x2c   : > { %2169 = vmatprep.mubr.msk.f32.mxu0 %vm2485_vm1, %v2484_v7 }
  0x2d   : > { %2071 = vmatmul.mubr.msk.f32.vlgmr.msra.gmra.mrb[4].mxu1 %vm385_vm0, %v553_v63 }
  0x2e   : > { %2174 = vmatprep.mubr.msk.f32.mxu1 %vm2485_vm1, %v2484_v7 }
  0xee   : > { %v455_v16 = vpop.f32.mrb[0].mxu0  ;;  %v526_v20 = vpop.f32.mrb[0].mxu1 }
  0xef   : > { %v457_v18 = vpop.f32.mrb[1].mxu0  ;;  %v528_v23 = vpop.f32.mrb[1].mxu1  ;;  %v456_v25 = vadd.f32 %v455_v16, %v368_v21  ;;  %v527_v42 = vadd.f32 %v526_v20, %v376_v36  ;;  %v1534_v16 = vld [vmem:[#allocation4 + $0x18] sm:$0xff] }
  0xf0   : > { %v458_v35 = vadd.f32 %v457_v18, %v372_v26  ;;  %v529_v46 = vadd.f32 %v528_v23, %v380_v43 }
  0xf1   : > { %v531_v34 = vmul.f32 0.35355338, %v456_v25  ;;  %v533_v45 = vmul.f32 0.35355338, %v527_v42 }
  0xf2   : > { %v532_v41 = vmul.f32 0.35355338, %v458_v35  ;;  %v534_v48 = vmul.f32 0.35355338, %v529_v46 }
  0xf6   : > { %v664_v28 = vpop.f32.mrb[2].mxu0 }
  0xf7   : > { %v665_v29 = vadd.f32 %v664_v28, %v577_v24  ;;  %v666_v31 = vpop.f32.mrb[3].mxu0 }
  0xf8   : > { %v735_v33 = vpop.f32.mrb[2].mxu1  ;;  %v667_v39 = vadd.f32 %v666_v31, %v581_v30 }
  0xf9   : > { %2168 = vmatpush3.xpose.msra.mxu0 %v665_v29  ;;  %v737_v38 = vpop.f32.mrb[3].mxu1  ;;  %v736_v40 = vadd.f32 %v735_v33, %v585_v32  ;;  %v767_v33 = vrot.slane %v2792_v49, %v2768_v22  ;;  %v775_v22 = vrot.slane %v2792_v49, %v2776_v37 }
  0xfa   : > { %2177 = vmatprep.subr.mxu0 %v2484_v7  ;;  %v738_v47 = vadd.f32 %v737_v38, %v589_v44  ;;  %v771_v38 = vrot.slane %v2792_v49, %v2771_v27 }
  0xfc   : > { %2170 = vmatmul.mubr.f32.vlgmr.msra.gmra.mrb[6].mxu0 %v531_v34 }
  0xfd   : > { %2178 = vmatpush3.xpose.msra.mxu0 %v667_v39  ;;  %2179 = vmatprep.mubr.msk.f32.mxu0 %vm2485_vm1, %v2484_v7 }
  0xfe   : > { %2187 = vmatprep.subr.mxu0 %v2484_v7  ;;  %v849_v51 = vpop.f32.mrb[4].mxu0 }
  0xff   : > { %v850_v52 = vadd.f32 %v849_v51, %v763_v50  ;;  %v2795_v53 = vpop.f32.mrb[5].mxu0 }
 0x100   : > { %2180 = vmatmul.mubr.f32.vlgmr.msra.gmra.mrb[8].mxu0 %v532_v41  ;;  %v920_v21 = vpop.f32.mrb[4].mxu1 }
 0x101   : > { %2188 = vmatpush3.xpose.msra.mxu0 %v736_v40  ;;  %2189 = vmatprep.mubr.msk.f32.mxu0 %vm2485_vm1, %v2484_v7  ;;  %v922_v23 = vpop.f32.mrb[5].mxu1  ;;  %v852_v40 = vadd.f32 %v2795_v53, %v767_v33  ;;  %v921_v43 = vadd.f32 %v920_v21, %v771_v38  ;;  %v1706_v21 = vld [vmem:[%s3139_s5 + $0x30] sm:$0xff]  ;;  %v1725_v33 = vld [vmem:[%s3139_s5 + $0xc8] sm:$0xff] }
 0x102   : > { %2197 = vmatprep.subr.mxu0 %v2484_v7  ;;  %2173 = vmatpush3.msra.mxu1 %v850_v52 }
 0x103   : > { %2182 = vmatprep.subr.mxu1 %v2484_v7 }
 0x104   : > { %2190 = vmatmul.mubr.f32.vlgmr.msra.gmra.mrb[10].mxu0 %v533_v45  ;;  %v923_v45 = vadd.f32 %v922_v23, %v775_v22  ;;  %v1709_v22 = vld [vmem:[%s3139_s5 + $0x48] sm:$0xff] }
 0x105   : > { %2198 = vmatpush3.xpose.msra.mxu0 %v738_v47  ;;  %2199 = vmatprep.mubr.msk.f32.mxu0 %vm2485_vm1, %v2484_v7 }
 0x108   : > { %2200 = vmatmul.mubr.f32.vlgmr.msra.gmra.mrb[12].mxu0 %v534_v48 }
 0x1cf   : > { %v992_v55 = vpop.f32.mrb[6].mxu0 }
 0x1d0   : > { %v2171_v56 = vpop.f32.mrb[7].mxu0  ;;  %v998_v57 = vsel %vm997_vm3, %v992_v55, -inf }
 0x1d1   : > { %999 = vmax.xlane.f32.xlu0 %v998_v57  ;;  %v1716_v56 = vld [vmem:[%s3139_s5 + $0x80] sm:$0xff]  ;;  %v1717_v57 = vld [vmem:[%s3139_s5 + $0x88] sm:$0xff] }
 0x1d3   : > { %v1171_v58 = vpop.f32.mrb[8].mxu0 }
 0x1d4   : > { %v2181_v59 = vpop.f32.mrb[9].mxu0  ;;  %v1177_v60 = vsel %vm997_vm3, %v1171_v58, -inf }
 0x1d5   : > { %1178 = vmax.xlane.f32.xlu0 %v1177_v60  ;;  %v2255_v59 = vpack.c.bf16 %v1717_v57, %v1716_v56  ;;  %v1701_v60 = vld [vmem:[%s3139_s5 + $0x8] sm:$0xff]  ;;  %v1013_v56 = vld [vmem:[#allocation5] sm:$0xff] }
 0x1d7   : > { %v1350_v61 = vpop.f32.mrb[10].mxu0  ;;  %2256 = vmatprep.subr.bf16.mxu0 %v2255_v59  ;;  %v1193_v59 = vld [vmem:[#allocation5 + $0x8] sm:$0xff] }
 0x1d8   : > { %v2191_v62 = vpop.f32.mrb[11].mxu0  ;;  %v1356_v63 = vsel %vm997_vm3, %v1350_v61, -inf }
 0x1d9   : > { %1357 = vmax.xlane.f32.xlu1 %v1356_v63  ;;  %v1719_v62 = vld [vmem:[%s3139_s5 + $0x98] sm:$0xff] }
 0x1db   : > { %v1529_v0 = vpop.f32.mrb[12].mxu0 }
 0x1dc   : > { %v2201_v1 = vpop.f32.mrb[13].mxu0  ;;  %v1535_v2 = vsel %vm997_vm3, %v1529_v0, -inf }
 0x1dd   : > { %1536 = vmax.xlane.f32.xlu1 %v1535_v2  ;;  %v1702_v1 = vld [vmem:[%s3139_s5 + $0x10] sm:$0xff]  ;;  %v1703_v2 = vld [vmem:[%s3139_s5 + $0x18] sm:$0xff] }
 0x25e   : > { %v1000_v5 = vpop.xlane.xlu0 %999 }
 0x25f   : > { %v1001_v6 = vmax.f32 %v2814_v4, %v1000_v5  ;;  %v2261_v5 = vpack.c.bf16 %v1703_v2, %v1702_v1 }
 0x261   : > { %v1002_v9 = vsub.f32 %v2814_v4, %v1001_v6  ;;  %1103 = vst.msk [vmem:[#allocation4] sm:$0xff] %vm539_vm2, %v1001_v6  ;;  %1007 = vperm.xlu0 %2378, %v1001_v6   ;;  %v1721_v4 = vld [vmem:[%s3139_s5 + $0xa8] sm:$0xff]  ;;  %v1704_v6 = vld [vmem:[%s3139_s5 + $0x20] sm:$0xff] }
 0x262   : > { %v1179_v10 = vpop.xlane.xlu0 %1178 }
 0x263   : > { %v2822_v11 = vmax.f32 %v2817_v8, %v1179_v10  ;;  %v1003_v37 = vmul.f32 1.442695, %v1002_v9  ;;  %v1749_v9 = vld [vmem:[%s3139_s5 + $0x188] sm:$0xff]  ;;  %v2263_v10 = vpack.c.bf16 %v1721_v4, %v1720_v3  ;;  %v1372_v4 = vld [vmem:[#allocation5 + $0x10] sm:$0xff] }
 0x265   : > { %v1181_v13 = vsub.f32 %v2817_v8, %v2822_v11  ;;  %1282 = vst.msk [vmem:[#allocation4 + $0x8] sm:$0xff] %vm539_vm2, %v2822_v11  ;;  %1186 = vperm.xlu1 %2379, %v2822_v11   ;;  %v1748_v8 = vld [vmem:[%s3139_s5 + $0x180] sm:$0xff]  ;;  %v1705_v11 = vld [vmem:[%s3139_s5 + $0x28] sm:$0xff] }
 0x266   : > { %v1358_v14 = vpop.xlane.xlu1 %1357 }
 0x267   : > { %v2832_v15 = vmax.f32 %v2824_v12, %v1358_v14  ;;  %v1182_v50 = vmul.f32 1.442695, %v1181_v13  ;;  %v1732_v13 = vld [vmem:[%s3139_s5 + $0x100] sm:$0xff]  ;;  %v1733_v14 = vld [vmem:[%s3139_s5 + $0x108] sm:$0xff] }
 0x269   : > { %v1360_v17 = vsub.f32 %v2824_v12, %v2832_v15  ;;  %1461 = vst.msk [vmem:[#allocation4 + $0x10] sm:$0xff] %vm539_vm2, %v2832_v15  ;;  %1365 = vperm.xlu1 %2379, %v2832_v15   ;;  %v2287_v12 = vpack.c.bf16 %v1749_v9, %v1748_v8  ;;  %v1722_v15 = vld [vmem:[%s3139_s5 + $0xb0] sm:$0xff] }
 0x26a   : > { %v1537_v18 = vpop.xlane.xlu1 %1536 }
 0x26b   : > { %v1538_v19 = vmax.f32 %v1534_v16, %v1537_v18  ;;  %v1750_v18 = vld [vmem:[%s3139_s5 + $0x190] sm:$0xff] }
 0x26d   : > { %v1539_v20 = vsub.f32 %v1534_v16, %v1538_v19  ;;  %1640 = vst.msk [vmem:[#allocation4 + $0x18] sm:$0xff] %vm539_vm2, %v1538_v19  ;;  %1544 = vperm.xlu1 %2379, %v1538_v19   ;;  %v1723_v16 = vld [vmem:[%s3139_s5 + $0xb8] sm:$0xff] }
 0x26e   : > { %v1751_v19 = vld [vmem:[%s3139_s5 + $0x198] sm:$0xff] }
 0x26f   : > { %v1540_v52 = vmul.f32 1.442695, %v1539_v20  ;;  %v2265_v20 = vpack.c.bf16 %v1705_v11, %v1704_v6  ;;  %v2291_v23 = vpack.c.bf16 %v1751_v19, %v1750_v18  ;;  %v1712_v18 = vld [vmem:[%s3139_s5 + $0x60] sm:$0xff]  ;;  %v1713_v19 = vld [vmem:[%s3139_s5 + $0x68] sm:$0xff] }
 0x2e0   : > { %v1008_v24 = vpop.permute.xlu0 %1007 }
 0x2e1   : > { %v1010_v25 = vsub.f32 %v992_v55, %v1008_v24  ;;  %v1734_v24 = vld [vmem:[%s3139_s5 + $0x110] sm:$0xff] }
 0x2e3   : > { %v1011_v26 = vmul.f32 1.442695, %v1010_v25  ;;  %v1735_v25 = vld [vmem:[%s3139_s5 + $0x118] sm:$0xff] }
 0x2e4   : > { %v1187_v28 = vpop.permute.xlu1 %1186 }
 0x2e5   : > { %2380 = vpow2.f32 %v1011_v26  ;;  %v1189_v29 = vsub.f32 %v1171_v58, %v1187_v28  ;;  %v1700_v58 = vld [vmem:[%s3139_s5] sm:$0xff]  ;;  %v2267_v26 = vpack.c.bf16 %v1723_v16, %v1722_v15  ;;  %v1707_v28 = vld [vmem:[%s3139_s5 + $0x38] sm:$0xff] }
 0x2e6   : > { %v2257_v63 = vpack.c.bf16 %v1701_v60, %v1700_v58  ;;  %v2269_v38 = vpack.c.bf16 %v1707_v28, %v1706_v21  ;;  %v1731_v28 = vld [vmem:[%s3139_s5 + $0xf8] sm:$0xff] }
 0x2e7   : > { %v1190_v30 = vmul.f32 1.442695, %v1189_v29  ;;  %v2293_v29 = vpack.c.bf16 %v1735_v25, %v1734_v24  ;;  %v1757_v24 = vld [vmem:[%s3139_s5 + $0x1c8] sm:$0xff]  ;;  %v1730_v25 = vld [vmem:[%s3139_s5 + $0xf0] sm:$0xff] }
 0x2e8   : > { %v1366_v31 = vpop.permute.xlu1 %1365  ;;  %2258 = vmatpush3.bf16.msra.mxu0 %v2257_v63 }
 0x2e9   : > { %2382 = vpow2.f32 %v1190_v30  ;;  %v1368_v32 = vsub.f32 %v1350_v61, %v1366_v31  ;;  %v1718_v61 = vld [vmem:[%s3139_s5 + $0x90] sm:$0xff]  ;;  %v1752_v30 = vld [vmem:[%s3139_s5 + $0x1a0] sm:$0xff]  ;;  %v1753_v31 = vld [vmem:[%s3139_s5 + $0x1a8] sm:$0xff] }
 0x2eb   : > { %v1369_v34 = vmul.f32 1.442695, %v1368_v32  ;;  %v1724_v32 = vld [vmem:[%s3139_s5 + $0xc0] sm:$0xff] }
 0x2ec   : > { %v1545_v35 = vpop.permute.xlu1 %1544 }
 0x2ed   : > { %2384 = vpow2.f32 %v1369_v34  ;;  %v1547_v36 = vsub.f32 %v1529_v0, %v1545_v35  ;;  %v2259_v0 = vpack.c.bf16 %v1719_v62, %v1718_v61  ;;  %v2295_v34 = vpack.c.bf16 %v1753_v31, %v1752_v30  ;;  %v1736_v35 = vld [vmem:[%s3139_s5 + $0x120] sm:$0xff]  ;;  %v1741_v30 = vld [vmem:[%s3139_s5 + $0x148] sm:$0xff] }
 0x2ef   : > { %v2381_v39 = vpop.eup %2380  ;;  %v1548_v41 = vmul.f32 1.442695, %v1547_v36  ;;  %2260 = vmatprep.subr.bf16.mxu0 %v2259_v0  ;;  %v1737_v36 = vld [vmem:[%s3139_s5 + $0x128] sm:$0xff]  ;;  %v1551_v0 = vld [vmem:[#allocation5 + $0x18] sm:$0xff] }
 0x2f0   : > { %2175 = vmatmul.mubr.msk.f32.vlgmr.msra.gmra.mrb[6].mxu1 %vm997_vm3, %v2381_v39  ;;  %v1015_v42 = vsel %vm997_vm3, %v2381_v39, 0.0  ;;  %2262 = vmatpush3.bf16.msra.mxu0 %v2261_v5  ;;  %v2297_v39 = vpack.c.bf16 %v1737_v36, %v1736_v35  ;;  %v1715_v35 = vld [vmem:[%s3139_s5 + $0x78] sm:$0xff] }
 0x2f1   : > { %2386 = vpow2.f32 %v1548_v41  ;;  %2183 = vmatpush3.msra.mxu1 %v852_v40  ;;  %1016 = vadd.xlane.f32.xlu0 %v1015_v42  ;;  %v1754_v40 = vld [vmem:[%s3139_s5 + $0x1b0] sm:$0xff]  ;;  %v1755_v41 = vld [vmem:[%s3139_s5 + $0x1b8] sm:$0xff]  ;;  %v2271_v42 = vpack.c.bf16 %v1725_v33, %v1724_v32  ;;  %v2283_v32 = vpack.c.bf16 %v1731_v28, %v1730_v25 }
 0x2f2   : > { %2184 = vmatprep.mubr.msk.f32.mxu1 %vm2485_vm1, %v2484_v7  ;;  %2192 = vmatprep.subr.mxu1 %v2484_v7  ;;  %2388 = vpow2.f32 %v1003_v37 }
 0x2f3   : > { %v2383_v27 = vpop.eup %2382  ;;  %2390 = vpow2.f32 %v1182_v50  ;;  %2264 = vmatprep.subr.bf16.mxu0 %v2263_v10  ;;  %v1729_v50 = vld [vmem:[%s3139_s5 + $0xe8] sm:$0xff] }
 0x2f4   : > { %2185 = vmatmul.mubr.msk.f32.vlgmr.msra.gmra.mrb[8].mxu1 %vm997_vm3, %v2383_v27  ;;  %v1195_v44 = vsel %vm997_vm3, %v2383_v27, 0.0  ;;  %2392 = vpow2.f32 %v1540_v52  ;;  %2266 = vmatpush3.bf16.msra.mxu0 %v2265_v20  ;;  %v2299_v27 = vpack.c.bf16 %v1755_v41, %v1754_v40  ;;  %v2281_v20 = vpack.c.bf16 %v1713_v19, %v1712_v18 }
 0x2f5   : > { %1196 = vadd.xlane.f32.xlu1 %v1195_v44  ;;  %2193 = vmatpush3.msra.mxu1 %v921_v43  ;;  %v1708_v43 = vld [vmem:[%s3139_s5 + $0x40] sm:$0xff]  ;;  %v1726_v44 = vld [vmem:[%s3139_s5 + $0xd0] sm:$0xff] }
 0x2f6   : > { %2194 = vmatprep.mubr.msk.f32.mxu1 %vm2485_vm1, %v2484_v7  ;;  %2202 = vmatprep.subr.mxu1 %v2484_v7 }
 0x2f7   : > { %v2385_v46 = vpop.eup %2384  ;;  %2268 = vmatprep.subr.bf16.mxu0 %v2267_v26 }
 0x2f8   : > { %2195 = vmatmul.mubr.msk.f32.vlgmr.msra.gmra.mrb[10].mxu1 %vm997_vm3, %v2385_v46  ;;  %v1374_v49 = vsel %vm997_vm3, %v2385_v46, 0.0  ;;  %2270 = vmatpush3.bf16.msra.mxu0 %v2269_v38  ;;  %v2273_v46 = vpack.c.bf16 %v1709_v22, %v1708_v43  ;;  %v1758_v38 = vld [vmem:[%s3139_s5 + $0x1d0] sm:$0xff]  ;;  %v1743_v43 = vld [vmem:[%s3139_s5 + $0x158] sm:$0xff] }
 0x2f9   : > { %2203 = vmatpush3.msra.mxu1 %v923_v45  ;;  %2204 = vmatprep.mubr.msk.f32.mxu1 %vm2485_vm1, %v2484_v7  ;;  %v1361_v7 = vmul.f32 1.442695, %v1360_v17  ;;  %v2289_v17 = vpack.c.bf16 %v1733_v14, %v1732_v13  ;;  %v1727_v45 = vld [vmem:[%s3139_s5 + $0xd8] sm:$0xff]  ;;  %v1738_v13 = vld [vmem:[%s3139_s5 + $0x130] sm:$0xff] }
 0x2fa   : > { %2288 = vmatprep.subr.bf16.mxu1 %v2287_v12  ;;  %2272 = vmatprep.subr.bf16.mxu0 %v2271_v42  ;;  %v2275_v37 = vpack.c.bf16 %v1727_v45, %v1726_v44  ;;  %v1739_v14 = vld [vmem:[%s3139_s5 + $0x138] sm:$0xff]  ;;  %v1742_v42 = vld [vmem:[%s3139_s5 + $0x150] sm:$0xff]  ;;  %v1760_v44 = vld [vmem:[%s3139_s5 + $0x1e0] sm:$0xff] }
 0x2fb   : > { %v2387_v47 = vpop.eup %2386  ;;  %2394 = vpow2.f32 %v1361_v7  ;;  %v1761_v45 = vld [vmem:[%s3139_s5 + $0x1e8] sm:$0xff] }
 0x2fc   : > { %2205 = vmatmul.mubr.msk.f32.vlgmr.msra.gmra.mrb[12].mxu1 %vm997_vm3, %v2387_v47  ;;  %v1553_v48 = vsel %vm997_vm3, %v2387_v47, 0.0  ;;  %v2866_v51 = vpop.eup %2388  ;;  %v1710_v47 = vld [vmem:[%s3139_s5 + $0x50] sm:$0xff]  ;;  %2274 = vmatpush3.bf16.msra.mxu0 %v2273_v46  ;;  %v1744_v46 = vld [vmem:[%s3139_s5 + $0x160] sm:$0xff] }
 0x2fd   : > { %1554 = vadd.xlane.f32.xlu1 %v1553_v48  ;;  %v2869_v53 = vpop.eup %2390  ;;  %2290 = vmatpush3.bf16.msra.mxu1 %v2289_v17  ;;  %v1711_v48 = vld [vmem:[%s3139_s5 + $0x58] sm:$0xff]  ;;  %v1014_v57 = vmul.f32 %v2866_v51, %v1013_v56  ;;  %v2301_v17 = vpack.c.bf16 %v1739_v14, %v1738_v13 }
 0x2fe   : > { %v2872_v54 = vpop.eup %2392  ;;  %2292 = vmatprep.subr.bf16.mxu1 %v2291_v23  ;;  %v2277_v52 = vpack.c.bf16 %v1711_v48, %v1710_v47  ;;  %2276 = vmatprep.subr.bf16.mxu0 %v2275_v37  ;;  %v1194_v61 = vmul.f32 %v2869_v53, %v1193_v59  ;;  %v1756_v23 = vld [vmem:[%s3139_s5 + $0x1c0] sm:$0xff]  ;;  %v2311_v47 = vpack.c.bf16 %v1761_v45, %v1760_v44  ;;  %v1745_v48 = vld [vmem:[%s3139_s5 + $0x168] sm:$0xff] }
 0x2ff   : > { %v1552_v2 = vmul.f32 %v2872_v54, %v1551_v0  ;;  %v2303_v26 = vpack.c.bf16 %v1757_v24, %v1756_v23 }
 0x300   : > { %2278 = vmatpush3.bf16.msra.mxu0 %v2277_v52 }
 0x301   : > { %1375 = vadd.xlane.f32.xlu1 %v1374_v49  ;;  %2294 = vmatpush3.bf16.msra.mxu1 %v2293_v29  ;;  %v1728_v49 = vld [vmem:[%s3139_s5 + $0xe0] sm:$0xff] }
 0x302   : > { %2296 = vmatprep.subr.bf16.mxu1 %v2295_v34  ;;  %v2279_v7 = vpack.c.bf16 %v1729_v50, %v1728_v49  ;;  %v1740_v29 = vld [vmem:[%s3139_s5 + $0x140] sm:$0xff]  ;;  %v1714_v34 = vld [vmem:[%s3139_s5 + $0x70] sm:$0xff]  ;;  %v2313_v50 = vpack.c.bf16 %v1745_v48, %v1744_v46 }
 0x303   : > { %v2305_v33 = vpack.c.bf16 %v1741_v30, %v1740_v29  ;;  %v2285_v36 = vpack.c.bf16 %v1715_v35, %v1714_v34  ;;  %v2076_v30 = vld [vmem:[%s3140_s6] ss:$0 sm:$0xff] }
 0x304   : > { %2280 = vmatprep.subr.bf16.mxu0 %v2279_v7 }
 0x305   : > { %v2875_v55 = vpop.eup %2394  ;;  %2298 = vmatpush3.bf16.msra.mxu1 %v2297_v39  ;;  %2282 = vmatpush3.bf16.msra.mxu0 %v2281_v20  ;;  %v1759_v39 = vld [vmem:[%s3139_s5 + $0x1d8] sm:$0xff] }
 0x306   : > { %2300 = vmatprep.subr.bf16.mxu1 %v2299_v27  ;;  %v1373_v6 = vmul.f32 %v2875_v55, %v1372_v4  ;;  %2284 = vmatprep.subr.bf16.mxu0 %v2283_v32  ;;  %v2307_v41 = vpack.c.bf16 %v1759_v39, %v1758_v38  ;;  %v2309_v27 = vpack.c.bf16 %v1743_v43, %v1742_v42 }
 0x307   : > { %1097 = vperm.xlu0 %2378, %v2866_v51  }
 0x309   : > { %2302 = vmatpush3.bf16.msra.mxu1 %v2301_v17  ;;  %2286 = vmatpush3.bf16.msra.mxu0 %v2285_v36 }
 0x30a   : > { %2304 = vmatprep.subr.bf16.mxu1 %v2303_v26 }
 0x30d   : > { %2306 = vmatpush3.bf16.msra.mxu1 %v2305_v33 }
 0x30e   : > { %2308 = vmatprep.subr.bf16.mxu1 %v2307_v41 }
 0x311   : > { %2310 = vmatpush3.bf16.msra.mxu1 %v2309_v27 }
 0x312   : > { %1276 = vperm.xlu1 %2379, %v2869_v53   ;;  %2312 = vmatprep.subr.bf16.mxu1 %v2311_v47 }
 0x315   : > { %2314 = vmatpush3.bf16.msra.mxu1 %v2313_v50 }
 0x316   : > { %1634 = vperm.xlu1 %2379, %v2872_v54  }
 0x31a   : > { %1455 = vperm.xlu1 %2379, %v2875_v55  }
 0x37e   : > { %v1017_v58 = vpop.xlane.xlu0 %1016 }
 0x37f   : > { %v1018_v60 = vadd.f32 %v1017_v58, %v1014_v57  ;;  %v1762_v57 = vld [vmem:[%s3139_s5 + $0x1f0] sm:$0xff]  ;;  %v1763_v58 = vld [vmem:[%s3139_s5 + $0x1f8] sm:$0xff] }
 0x380   : > { %v2315_v59 = vpack.c.bf16 %v1763_v58, %v1762_v57 }
 0x381   : > { %1020 = vst.msk [vmem:[#allocation5] sm:$0xff] %vm539_vm2, %v1018_v60  ;;  %v1746_v60 = vld [vmem:[%s3139_s5 + $0x170] sm:$0xff] }
 0x382   : > { %v1197_v62 = vpop.xlane.xlu1 %1196  ;;  %2316 = vmatprep.subr.bf16.mxu1 %v2315_v59 }
 0x383   : > { %v1198_v63 = vadd.f32 %v1197_v62, %v1194_v61  ;;  %v1747_v61 = vld [vmem:[%s3139_s5 + $0x178] sm:$0xff] }
 0x385   : > { %1199 = vst.msk [vmem:[#allocation5 + $0x8] sm:$0xff] %vm539_vm2, %v1198_v63  ;;  %v2317_v63 = vpack.c.bf16 %v1747_v61, %v1746_v60 }
 0x387   : > { %2318 = vmatpush3.bf16.msra.mxu1 %v2317_v63 }
 0x388   : > { %v1644_v1 = vld [vmem:[#allocation5] sm:$0xff] }
 0x389   : > { %2396 = vrcp.f32 %v1644_v1 }
 0x38a   : > { %v1555_v3 = vpop.xlane.xlu1 %1554 }
 0x38b   : > { %v1556_v5 = vadd.f32 %v1555_v3, %v1552_v2 }
 0x38c   : > { %v1657_v51 = vld [vmem:[#allocation5 + $0x8] sm:$0xff] }
 0x38d   : > { %1557 = vst.msk [vmem:[#allocation5 + $0x18] sm:$0xff] %vm539_vm2, %v1556_v5  ;;  %2398 = vrcp.f32 %v1657_v51 }
 0x38e   : > { %v1376_v8 = vpop.xlane.xlu1 %1375 }
 0x38f   : > { %v1377_v53 = vadd.f32 %v1376_v8, %v1373_v6 }
 0x391   : > { %1378 = vst.msk [vmem:[#allocation5 + $0x10] sm:$0xff] %vm539_vm2, %v1377_v53 }
 0x392   : > { %v1277_v8 = vpop.permute.xlu1 %1276 }
 0x393   : > { %v2397_v9 = vpop.eup %2396 }
 0x394   : > { %v1646_v10 = vmul.f32 %v2397_v9, %v1644_v1  ;;  %v1683_v11 = vld [vmem:[#allocation5 + $0x18] sm:$0xff] }
 0x395   : > { %2400 = vrcp.f32 %v1683_v11 }
 0x396   : > { %v1647_v12 = vsub.f32 2.0, %v1646_v10  ;;  %v1635_v53 = vpop.permute.xlu1 %1634 }
 0x397   : > { %v2399_v54 = vpop.eup %2398  ;;  %v1637_v17 = vmul.f32 0.0, %v1635_v53 }
 0x398   : > { %v1648_v55 = vmul.f32 %v2397_v9, %v1647_v12  ;;  %v1659_v15 = vmul.f32 %v2399_v54, %v1657_v51  ;;  %v1670_v16 = vld [vmem:[#allocation5 + $0x10] sm:$0xff]  ;;  %v1098_v9 = vpop.permute.xlu0 %1097 }
 0x399   : > { %2402 = vrcp.f32 %v1670_v16  ;;  %v1100_v12 = vmul.f32 0.0, %v1098_v9 }
 0x39a   : > { %1652 = vperm.xlu0 %2378, %v1648_v55   ;;  %v1660_v21 = vsub.f32 2.0, %v1659_v15  ;;  %v1456_v10 = vpop.permute.xlu1 %1455 }
 0x39b   : > { %v1458_v20 = vmul.f32 0.0, %v1456_v10 }
 0x39c   : > { %v1661_v31 = vmul.f32 %v2399_v54, %v1660_v21 }
 0x39e   : > { %1665 = vperm.xlu1 %2379, %v1661_v31  }
 0x39f   : > { %v2401_v40 = vpop.eup %2400 }
 0x3a0   : > { %v1685_v22 = vmul.f32 %v2401_v40, %v1683_v11  ;;  %v1279_v11 = vmul.f32 0.0, %v1277_v8 }
 0x3a2   : > { %v1686_v37 = vsub.f32 2.0, %v1685_v22 }
 0x3a3   : > { %v2403_v49 = vpop.eup %2402 }
 0x3a4   : > { %v1687_v52 = vmul.f32 %v2401_v40, %v1686_v37  ;;  %v1672_v7 = vmul.f32 %v2403_v49, %v1670_v16 }
 0x3a6   : > { %1691 = vperm.xlu1 %2379, %v1687_v52   ;;  %v1673_v56 = vsub.f32 2.0, %v1672_v7 }
 0x3a8   : > { %v1674_v62 = vmul.f32 %v2403_v49, %v1673_v56 }
 0x3aa   : > { %1678 = vperm.xlu0 %2378, %v1674_v62  }
 0x3c3   : > { %v1090_v0 = vpop.f32.mrb[6].mxu1 }
 0x3c4   : > { %v2176_v1 = vpop.f32.mrb[7].mxu1  ;;  %v1101_v14 = vadd.f32 %v1100_v12, %v1090_v0 }
 0x3c7   : > { %v1269_v2 = vpop.f32.mrb[8].mxu1 }
 0x3c8   : > { %v2186_v3 = vpop.f32.mrb[9].mxu1  ;;  %v1280_v54 = vadd.f32 %v1279_v11, %v1269_v2 }
 0x3cb   : > { %v1448_v4 = vpop.f32.mrb[10].mxu1 }
 0x3cc   : > { %v2196_v5 = vpop.f32.mrb[11].mxu1  ;;  %v1459_v23 = vadd.f32 %v1458_v20, %v1448_v4 }
 0x3cf   : > { %v1627_v51 = vpop.f32.mrb[12].mxu1 }
 0x3d0   : > { %v2206_v6 = vpop.f32.mrb[13].mxu1  ;;  %v1638_v18 = vadd.f32 %v1637_v17, %v1627_v51 }
 0x419   : > { %v1653_v13 = vpop.permute.xlu0 %1652 }
 0x41a   : > { %v1655_v16 = vmul.f32 %v1653_v13, %v1101_v14 }
 0x41d   : > { %v1666_v55 = vpop.permute.xlu1 %1665 }
 0x41e   : > { %v1668_v15 = vmul.f32 %v1666_v55, %v1280_v54 }
 0x420   : > { %1835 = vmatprep.mubr.f32.mxu0 %v1668_v15 }
 0x421   : > { %1836 = vmatmul.mubr.f32.vlgmr.msra.gmra.mrb[14].mxu0 %v1655_v16 }
 0x425   : > { %v1692_v19 = vpop.permute.xlu1 %1691 }
 0x426   : > { %v1694_v21 = vmul.f32 %v1692_v19, %v1638_v18 }
 0x428   : > { %1905 = vmatprep.mubr.f32.mxu1 %v1694_v21 }
 0x429   : > { %v1679_v24 = vpop.permute.xlu0 %1678 }
 0x42a   : > { %v1681_v25 = vmul.f32 %v1679_v24, %v1459_v23 }
 0x42c   : > { %1906 = vmatmul.mubr.f32.vlgmr.msra.gmra.mrb[14].mxu1 %v1681_v25 }
 0x4f4   : > { %v2129_v26 = vpop.f32.mrb[14].mxu0 }
 0x4f5   : > { %v2130_v28 = vpop.f32.mrb[15].mxu0 }
 0x4f6   : > { %v2131_v29 = vadd.f32 %v2130_v28, %v2129_v26 }
 0x4f8   : > { %v1838_v33 = vadd.f32 %v2131_v29, %v2076_v30 }
 0x4ff   : > { %v2164_v31 = vpop.f32.mrb[14].mxu1 }
 0x500   : > { %v2165_v32 = vpop.f32.mrb[15].mxu1 }
 0x501   : > { %v2166_v34 = vadd.f32 %v2165_v32, %v2164_v31 }
 0x503   : > { %v1908_v35 = vadd.f32 %v2166_v34, %v1838_v33 }
 0x505   : > { %1911 = vst.msk [vmem:[%s323_s19] sm:$0xff] %vm385_vm0, %v1908_v35 }
 0x506   : > { %2417 = shalt.err (!%p2414_p5)
}
 0x507   : > { %s2418_s15 = scalar_lea.hbm %s3086_s30, 128  ;;  %s2422_s18 = scalar_lea.hbm %s3141_s7, 256 }
 0x508   : > { %p2419_p6 = scmp.ne.s32.totalorder %s3086_s30, %s2418_s15  ;;  %p2423_p10 = scmp.lt.u32.totalorder %s3086_s30, %s3141_s7 }
 0x509   : > { %p2424_p11 = scmp.lt.u32.totalorder %s2422_s18, %s2418_s15  ;;  %p2426_p13 = scmp.lt.u32.totalorder %s2418_s15, %s3086_s30 }
 0x50a   : > { %p2420_p7 = pnand %p2419_p6, %p2569_p4 }
 0x50b   : > { %p2425_p12 = por %p2424_p11, %p2423_p10 }
 0x50c   : > { %p2421_p9 = pneg %p2420_p7 }
 0x50d   : > { %p2427_p0 = por %p2426_p13, %p2425_p12 }
 0x50f   : > { %p2428_p1 = pnand %p2427_p0, %p2421_p9 }
 0x511   : > { %2431 = shalt.err (!%p2428_p1)
}
 0x512   : > { %2319 = dma.vmem_to_hbm [thread:$0]  (%p2569_p4), %s3088_s21, 128, %s3086_s30, %s1913_s8  }
 0x513 PF: > { %p2325_p2 = scmp.ge.s32.totalorder %s2482_s29, 2  ;;  %s1938_s23 = sand.u32 1, %s2462_s24  }
 0x514   : > { %s1939_s10 = scalar_lea.sflag [#allocation7], %s1938_s23 }
 0x515   : > { %p2322_p3 = pnand %p2325_p2, %p2576_p8 }
 0x517   : > { %2457 = dma.done.wait (!%p2322_p3), %s1939_s10, 128  }
 0x518   : > { %2459 = vsyncadd (!%p2322_p3), %s1939_s10, 4294967168  ;;  %s20_s29 = sadd.s32 1, %s2482_s29   ;;  %s3144_s24 = smov %s2466_s25 }
 0x519   : > { %p17_p5 = scmp.ge.s32.totalorder %s20_s29, 4   ;;  %s3145_s25 = smov %s2470_s26 }
 0x51a   : > { %s3146_s26 = smov %s2582_s14  ;;  %s3147_s27 = smov %s2478_s28 }
 0x51b   : > { %s3148_s28 = smov %s3150_s9  ;;  %19 = sbr.rel (!%p17_p5) target bundleno = 4 (0x4), region = 107 }
 0x522   :  { %1944 = vsyncpa [#allocation7], 1 }
 0x523   :  { %1946 = vsyncpa [#allocation7 + $0x1], 1 }

</bundles_post_ra>
